<compile_context>
chip_gen: v7x
topology: tpu7x:2x2x1
jax: 0.10.0
libtpu: 0.0.40
codegen_flags: <defaults>
</compile_context>

<pallas_src>
import functools

import jax
import jax.numpy as jnp
from jax import lax
from jax.experimental import pallas as pl
from jax.experimental.pallas import tpu as pltpu

_BN_EPS = 1e-5  # PyTorch BatchNorm1d default eps

# Contract over the batch (row) axis of both operands: X^T X on the MXU.
_TN_DIMS = (((0,), (0,)), ((), ()))


def _self_contrastive_kernel(xs_ref, xl_ref, out_ref,
                             sum_s, sum_l, sq_s, sq_l, cross,
                             g_ss, g_ll, obuf,
                             *, lambda_, b_true, feat_true):
    tile = pl.program_id(0)
    n_tiles = pl.num_programs(0)

    @pl.when(tile == 0)
    def _init():
        sum_s[...] = jnp.zeros_like(sum_s)
        sum_l[...] = jnp.zeros_like(sum_l)
        sq_s[...] = jnp.zeros_like(sq_s)
        sq_l[...] = jnp.zeros_like(sq_l)
        cross[...] = jnp.zeros_like(cross)
        g_ss[...] = jnp.zeros_like(g_ss)
        g_ll[...] = jnp.zeros_like(g_ll)

    # ---- fused accumulation pass (every tile) ----
    xs_raw = xs_ref[...]
    xl_raw = xl_ref[...]
    xs = xs_raw.astype(jnp.float32)
    xl = xl_raw.astype(jnp.float32)

    # Per-feature moments (f32, VPU/XLU; hidden under MXU / DMA).  Zero-padded
    # rows/columns contribute nothing.
    sum_s[...] += jnp.sum(xs, axis=0, keepdims=True)
    sum_l[...] += jnp.sum(xl, axis=0, keepdims=True)
    sq_s[...] += jnp.sum(xs * xs, axis=0, keepdims=True)
    sq_l[...] += jnp.sum(xl * xl, axis=0, keepdims=True)
    cross[...] += jnp.sum(xs * xl, axis=0, keepdims=True)

    # Raw Grams: feed the MXU with the input dtype, accumulate in f32.
    g_ss[...] += lax.dot_general(xs_raw, xs_raw, _TN_DIMS,
                                 preferred_element_type=jnp.float32)
    g_ll[...] += lax.dot_general(xl_raw, xl_raw, _TN_DIMS,
                                 preferred_element_type=jnp.float32)

    # ---- epilogue: analytic BatchNorm correction + loss ----
    @pl.when(tile == n_tiles - 1)
    def _finalize():
        b = float(b_true)
        inv_b = 1.0 / b
        mean_s = sum_s[...] * inv_b
        mean_l = sum_l[...] * inv_b
        # E[x^2] - E[x]^2 can go slightly negative from roundoff: clamp.
        var_s = jnp.maximum(sq_s[...] * inv_b - mean_s * mean_s, 0.0)
        var_l = jnp.maximum(sq_l[...] * inv_b - mean_l * mean_l, 0.0)
        scale_s = lax.rsqrt(var_s + _BN_EPS) * inv_b   # 1/B folded in
        scale_l = lax.rsqrt(var_l + _BN_EPS) * inv_b

        # Traces from per-feature stats:  tr(s^T s), tr(l^T l), tr(s^T l).
        css_s = sq_s[...] - b * mean_s * mean_s
        css_l = sq_l[...] - b * mean_l * mean_l
        csl = cross[...] - b * mean_s * mean_l
        tr_ss = jnp.sum(scale_s * scale_s * css_s)
        tr_ll = jnp.sum(scale_l * scale_l * css_l)
        tr_sl = jnp.sum(scale_s * scale_l * csl)

        def _outer(row):
            # row: (1, F)  ->  (F, F) = row^T row, via the same transposed-lhs
            # matmul pattern as the main Gram (no transposes / relayouts).
            obuf[...] = jnp.zeros_like(obuf)
            obuf[0:1, :] = row
            v = obuf[...]
            return lax.dot_general(v, v, _TN_DIMS,
                                   preferred_element_type=jnp.float32)

        def _gram_sq(graw_ref, mean, scale):
            # sum(G^2) with G = diag(scale) (G_raw - B m m^T) diag(scale).
            mm = _outer(mean)
            ss = _outer(scale)
            g = (graw_ref[...] - b * mm) * ss
            return jnp.sum(g * g)

        ss2 = _gram_sq(g_ss, mean_s, scale_s)
        ll2 = _gram_sq(g_ll, mean_l, scale_l)

        # ||G - I||_F^2 = sum(G^2) - 2 tr(G) + F  (true F, not the padded one).
        c_style = ss2 - 2.0 * tr_ss + float(feat_true)
        c_ling = ll2 - 2.0 * tr_ll + float(feat_true)
        # D = ||s - l||_F^2 = tr(s^T s) + tr(l^T l) - 2 tr(s^T l)
        d_term = tr_ss + tr_ll - 2.0 * tr_sl
        out_ref[0, 0] = d_term + lambda_ * (c_ling + c_style)


def self_contrastive_loss(x_style, x_linguistics, lambda_=0.1):
    assert x_style.shape == x_linguistics.shape and x_style.ndim == 2
    b, feat = x_style.shape
    dtype = x_style.dtype
    itemsize = jnp.dtype(dtype).itemsize

    # Lane-dense feature axis: pad F to a multiple of 128.  Zero feature
    # columns drop out of every term analytically (the "+F" uses the true F).
    feat_pad = max(128, ((feat + 127) // 128) * 128)

    # Sublane packing for the input dtype (8 rows f32, 16 bf16, 32 int8/fp8).
    sub = max(8, 8 * (4 // max(itemsize, 1)))

    # Batch tile: up to 512 rows, shrunk so Gram scratch + double-buffered
    # input tiles stay within ~48 MiB (headroom for v7x's 64 MiB VMEM).
    gram_bytes = 2 * feat_pad * feat_pad * 4
    vmem_budget = 48 * 1024 * 1024
    per_row_bytes = 2 * 2 * feat_pad * itemsize       # 2 inputs, double-buffered
    tb_by_vmem = (vmem_budget - gram_bytes) // max(per_row_bytes, 1)
    tb = int(min(512, max(sub, tb_by_vmem)))
    tb = max(sub, (tb // sub) * sub)
    if b <= tb:
        tb = ((b + sub - 1) // sub) * sub
    # TODO(synk): feature-block tile g_ss/g_ll (upper-triangular blocks) and
    # shard batch tiles across v7x's two TensorCores for very large F
    # (feat_pad >~ 2300 no longer fits the 64 MiB VMEM with this layout).

    b_pad = ((b + tb - 1) // tb) * tb
    pad_rows = b_pad - b
    pad_cols = feat_pad - feat
    if pad_rows or pad_cols:
        pads = ((0, pad_rows), (0, pad_cols))
        x_style = jnp.pad(x_style, pads)
        x_linguistics = jnp.pad(x_linguistics, pads)
    n_tiles = b_pad // tb

    vmem_limit = (gram_bytes                               # Gram accumulators
                  + 3 * feat_pad * feat_pad * 4            # epilogue temporaries
                  + 2 * 2 * tb * feat_pad * itemsize       # double-buffered inputs
                  + 8 * 8 * feat_pad * 4                   # stat rows + outer buf
                  + (4 << 20))                             # slack
    vmem_limit = int(min(max(vmem_limit, 32 << 20), 128 << 20))

    kernel = functools.partial(
        _self_contrastive_kernel,
        lambda_=float(lambda_), b_true=b, feat_true=feat)

    out = pl.pallas_call(
        kernel,
        out_shape=jax.ShapeDtypeStruct((1, 1), jnp.float32),
        grid_spec=pltpu.PrefetchScalarGridSpec(
            num_scalar_prefetch=0,
            grid=(n_tiles,),
            in_specs=[
                pl.BlockSpec((tb, feat_pad), lambda i: (i, 0)),
                pl.BlockSpec((tb, feat_pad), lambda i: (i, 0)),
            ],
            out_specs=pl.BlockSpec(memory_space=pltpu.MemorySpace.SMEM),
            scratch_shapes=[
                pltpu.VMEM((1, feat_pad), jnp.float32),         # sum_s
                pltpu.VMEM((1, feat_pad), jnp.float32),         # sum_l
                pltpu.VMEM((1, feat_pad), jnp.float32),         # sq_s
                pltpu.VMEM((1, feat_pad), jnp.float32),         # sq_l
                pltpu.VMEM((1, feat_pad), jnp.float32),         # cross
                pltpu.VMEM((feat_pad, feat_pad), jnp.float32),  # G_ss raw
                pltpu.VMEM((feat_pad, feat_pad), jnp.float32),  # G_ll raw
                pltpu.VMEM((8, feat_pad), jnp.float32),         # outer-product buf
            ]),
        compiler_params=pltpu.CompilerParams(
            dimension_semantics=("arbitrary",),       # accumulators carried
            vmem_limit_bytes=vmem_limit),
    )(x_style, x_linguistics)
    return out[0, 0]


def _reference(x_style, x_linguistics, lambda_=0.1):
    # Pure-JAX reference (direct formulation).  HIGHEST precision matmuls so
    # the reference itself is not bf16-noisy on TPU.
    b = x_style.shape[0]

    def bn(x):
        m = jnp.mean(x, axis=0, keepdims=True)
        v = jnp.mean((x - m) ** 2, axis=0, keepdims=True)
        return (x - m) / jnp.sqrt(v + _BN_EPS) / b

    hi = lax.Precision.HIGHEST
    s = bn(x_style.astype(jnp.float32))
    l = bn(x_linguistics.astype(jnp.float32))
    d = jnp.sum((s - l) ** 2)
    eye = jnp.eye(x_style.shape[1], dtype=jnp.float32)
    c_l = jnp.sum((jnp.dot(l.T, l, precision=hi) - eye) ** 2)
    c_s = jnp.sum((jnp.dot(s.T, s, precision=hi) - eye) ** 2)
    return d + lambda_ * (c_l + c_s)


if __name__ == "__main__":
    key = jax.random.PRNGKey(0)
    k1, k2 = jax.random.split(key)
    B, F = 8, 32  # small synthetic shapes: batch=8, hidden=32
    x_style = jax.random.normal(k1, (B, F), dtype=jnp.float32)
    x_linguistics = jax.random.normal(k2, (B, F), dtype=jnp.float32)

    loss = self_contrastive_loss(x_style, x_linguistics, lambda_=0.1)
    loss = jax.block_until_ready(loss)

    ref = _reference(x_style, x_linguistics, lambda_=0.1)
    assert jnp.allclose(loss, ref, rtol=1e-3, atol=1e-3), (loss, ref)
    print("KERNEL_OK")
</pallas_src>

<mosaic_0001>
module attributes {stable_mosaic.version = 11 : i64} {
  func.func @_self_contrastive_kernel(%arg0: i32, %arg1: memref<8x128xf32, #tpu.memory_space<vmem>>, %arg2: memref<8x128xf32, #tpu.memory_space<vmem>>, %arg3: memref<1x1xf32, #tpu.memory_space<smem>>, %arg4: memref<1x128xf32, #tpu.memory_space<vmem>>, %arg5: memref<1x128xf32, #tpu.memory_space<vmem>>, %arg6: memref<1x128xf32, #tpu.memory_space<vmem>>, %arg7: memref<1x128xf32, #tpu.memory_space<vmem>>, %arg8: memref<1x128xf32, #tpu.memory_space<vmem>>, %arg9: memref<128x128xf32, #tpu.memory_space<vmem>>, %arg10: memref<128x128xf32, #tpu.memory_space<vmem>>, %arg11: memref<8x128xf32, #tpu.memory_space<vmem>>) attributes {dimension_semantics = [#tpu.dimension_semantics<arbitrary>], iteration_bounds = array<i64: 1>, scalar_prefetch = 0 : i64, scratch_operands = 8 : i64, tpu.core_type = #tpu.core_type<tc>, window_params = [{transform_indices = @transform_0, window_bounds = array<i64: 8, 128>}, {transform_indices = @transform_1, window_bounds = array<i64: 8, 128>}, {transform_indices = @transform_2, window_bounds = array<i64: 1, 1>}]} {
    %c0_i32 = arith.constant 0 : i32
    %0 = arith.cmpi eq, %arg0, %c0_i32 : i32
    %1 = arith.extui %0 : i1 to i32
    %c0_i32_0 = arith.constant 0 : i32
    %2 = arith.cmpi ne, %1, %c0_i32_0 : i32
    scf.if %2 {
      %cst_40 = arith.constant 0.000000e+00 : f32
      %44 = vector.broadcast %cst_40 : f32 to vector<1x128xf32>
      %c0_41 = arith.constant 0 : index
      %c0_42 = arith.constant 0 : index
      %45 = vector.load %arg4[%c0_41, %c0_42] : memref<1x128xf32, #tpu.memory_space<vmem>>, vector<1x128xf32>
      tpu.vector_store %arg4[%c0_41, %c0_42], %44 {strides = array<i32>} : memref<1x128xf32, #tpu.memory_space<vmem>>, vector<1x128xf32>,
      %cst_43 = arith.constant 0.000000e+00 : f32
      %46 = vector.broadcast %cst_43 : f32 to vector<1x128xf32>
      %c0_44 = arith.constant 0 : index
      %c0_45 = arith.constant 0 : index
      %47 = vector.load %arg5[%c0_44, %c0_45] : memref<1x128xf32, #tpu.memory_space<vmem>>, vector<1x128xf32>
      tpu.vector_store %arg5[%c0_44, %c0_45], %46 {strides = array<i32>} : memref<1x128xf32, #tpu.memory_space<vmem>>, vector<1x128xf32>,
      %cst_46 = arith.constant 0.000000e+00 : f32
      %48 = vector.broadcast %cst_46 : f32 to vector<1x128xf32>
      %c0_47 = arith.constant 0 : index
      %c0_48 = arith.constant 0 : index
      %49 = vector.load %arg6[%c0_47, %c0_48] : memref<1x128xf32, #tpu.memory_space<vmem>>, vector<1x128xf32>
      tpu.vector_store %arg6[%c0_47, %c0_48], %48 {strides = array<i32>} : memref<1x128xf32, #tpu.memory_space<vmem>>, vector<1x128xf32>,
      %cst_49 = arith.constant 0.000000e+00 : f32
      %50 = vector.broadcast %cst_49 : f32 to vector<1x128xf32>
      %c0_50 = arith.constant 0 : index
      %c0_51 = arith.constant 0 : index
      %51 = vector.load %arg7[%c0_50, %c0_51] : memref<1x128xf32, #tpu.memory_space<vmem>>, vector<1x128xf32>
      tpu.vector_store %arg7[%c0_50, %c0_51], %50 {strides = array<i32>} : memref<1x128xf32, #tpu.memory_space<vmem>>, vector<1x128xf32>,
      %cst_52 = arith.constant 0.000000e+00 : f32
      %52 = vector.broadcast %cst_52 : f32 to vector<1x128xf32>
      %c0_53 = arith.constant 0 : index
      %c0_54 = arith.constant 0 : index
      %53 = vector.load %arg8[%c0_53, %c0_54] : memref<1x128xf32, #tpu.memory_space<vmem>>, vector<1x128xf32>
      tpu.vector_store %arg8[%c0_53, %c0_54], %52 {strides = array<i32>} : memref<1x128xf32, #tpu.memory_space<vmem>>, vector<1x128xf32>,
      %cst_55 = arith.constant 0.000000e+00 : f32
      %54 = vector.broadcast %cst_55 : f32 to vector<128x128xf32>
      %c0_56 = arith.constant 0 : index
      %c0_57 = arith.constant 0 : index
      %55 = vector.load %arg9[%c0_56, %c0_57] : memref<128x128xf32, #tpu.memory_space<vmem>>, vector<128x128xf32>
      tpu.vector_store %arg9[%c0_56, %c0_57], %54 {strides = array<i32>} : memref<128x128xf32, #tpu.memory_space<vmem>>, vector<128x128xf32>,
      %cst_58 = arith.constant 0.000000e+00 : f32
      %56 = vector.broadcast %cst_58 : f32 to vector<128x128xf32>
      %c0_59 = arith.constant 0 : index
      %c0_60 = arith.constant 0 : index
      %57 = vector.load %arg10[%c0_59, %c0_60] : memref<128x128xf32, #tpu.memory_space<vmem>>, vector<128x128xf32>
      tpu.vector_store %arg10[%c0_59, %c0_60], %56 {strides = array<i32>} : memref<128x128xf32, #tpu.memory_space<vmem>>, vector<128x128xf32>,
    } else {
    }
    %c0 = arith.constant 0 : index
    %c0_1 = arith.constant 0 : index
    %3 = vector.load %arg1[%c0, %c0_1] : memref<8x128xf32, #tpu.memory_space<vmem>>, vector<8x128xf32>
    %c0_2 = arith.constant 0 : index
    %c0_3 = arith.constant 0 : index
    %4 = vector.load %arg2[%c0_2, %c0_3] : memref<8x128xf32, #tpu.memory_space<vmem>>, vector<8x128xf32>
    %c0_4 = arith.constant 0 : index
    %c0_5 = arith.constant 0 : index
    %5 = vector.load %arg4[%c0_4, %c0_5] : memref<1x128xf32, #tpu.memory_space<vmem>>, vector<1x128xf32>
    %cst = arith.constant dense<0.000000e+00> : vector<128xf32>
    %6 = vector.multi_reduction <add>, %3, %cst [0] : vector<8x128xf32> to vector<128xf32>
    %7 = vector.shape_cast %6 : vector<128xf32> to vector<1x128xf32>
    %8 = arith.addf %5, %7 : vector<1x128xf32>
    %c0_6 = arith.constant 0 : index
    %c0_7 = arith.constant 0 : index
    %9 = vector.load %arg4[%c0_6, %c0_7] : memref<1x128xf32, #tpu.memory_space<vmem>>, vector<1x128xf32>
    tpu.vector_store %arg4[%c0_6, %c0_7], %8 {strides = array<i32>} : memref<1x128xf32, #tpu.memory_space<vmem>>, vector<1x128xf32>,
    %c0_8 = arith.constant 0 : index
    %c0_9 = arith.constant 0 : index
    %10 = vector.load %arg5[%c0_8, %c0_9] : memref<1x128xf32, #tpu.memory_space<vmem>>, vector<1x128xf32>
    %cst_10 = arith.constant dense<0.000000e+00> : vector<128xf32>
    %11 = vector.multi_reduction <add>, %4, %cst_10 [0] : vector<8x128xf32> to vector<128xf32>
    %12 = vector.shape_cast %11 : vector<128xf32> to vector<1x128xf32>
    %13 = arith.addf %10, %12 : vector<1x128xf32>
    %c0_11 = arith.constant 0 : index
    %c0_12 = arith.constant 0 : index
    %14 = vector.load %arg5[%c0_11, %c0_12] : memref<1x128xf32, #tpu.memory_space<vmem>>, vector<1x128xf32>
    tpu.vector_store %arg5[%c0_11, %c0_12], %13 {strides = array<i32>} : memref<1x128xf32, #tpu.memory_space<vmem>>, vector<1x128xf32>,
    %c0_13 = arith.constant 0 : index
    %c0_14 = arith.constant 0 : index
    %15 = vector.load %arg6[%c0_13, %c0_14] : memref<1x128xf32, #tpu.memory_space<vmem>>, vector<1x128xf32>
    %16 = arith.mulf %3, %3 : vector<8x128xf32>
    %cst_15 = arith.constant dense<0.000000e+00> : vector<128xf32>
    %17 = vector.multi_reduction <add>, %16, %cst_15 [0] : vector<8x128xf32> to vector<128xf32>
    %18 = vector.shape_cast %17 : vector<128xf32> to vector<1x128xf32>
    %19 = arith.addf %15, %18 : vector<1x128xf32>
    %c0_16 = arith.constant 0 : index
    %c0_17 = arith.constant 0 : index
    %20 = vector.load %arg6[%c0_16, %c0_17] : memref<1x128xf32, #tpu.memory_space<vmem>>, vector<1x128xf32>
    tpu.vector_store %arg6[%c0_16, %c0_17], %19 {strides = array<i32>} : memref<1x128xf32, #tpu.memory_space<vmem>>, vector<1x128xf32>,
    %c0_18 = arith.constant 0 : index
    %c0_19 = arith.constant 0 : index
    %21 = vector.load %arg7[%c0_18, %c0_19] : memref<1x128xf32, #tpu.memory_space<vmem>>, vector<1x128xf32>
    %22 = arith.mulf %4, %4 : vector<8x128xf32>
    %cst_20 = arith.constant dense<0.000000e+00> : vector<128xf32>
    %23 = vector.multi_reduction <add>, %22, %cst_20 [0] : vector<8x128xf32> to vector<128xf32>
    %24 = vector.shape_cast %23 : vector<128xf32> to vector<1x128xf32>
    %25 = arith.addf %21, %24 : vector<1x128xf32>
    %c0_21 = arith.constant 0 : index
    %c0_22 = arith.constant 0 : index
    %26 = vector.load %arg7[%c0_21, %c0_22] : memref<1x128xf32, #tpu.memory_space<vmem>>, vector<1x128xf32>
    tpu.vector_store %arg7[%c0_21, %c0_22], %25 {strides = array<i32>} : memref<1x128xf32, #tpu.memory_space<vmem>>, vector<1x128xf32>,
    %c0_23 = arith.constant 0 : index
    %c0_24 = arith.constant 0 : index
    %27 = vector.load %arg8[%c0_23, %c0_24] : memref<1x128xf32, #tpu.memory_space<vmem>>, vector<1x128xf32>
    %28 = arith.mulf %3, %4 : vector<8x128xf32>
    %cst_25 = arith.constant dense<0.000000e+00> : vector<128xf32>
    %29 = vector.multi_reduction <add>, %28, %cst_25 [0] : vector<8x128xf32> to vector<128xf32>
    %30 = vector.shape_cast %29 : vector<128xf32> to vector<1x128xf32>
    %31 = arith.addf %27, %30 : vector<1x128xf32>
    %c0_26 = arith.constant 0 : index
    %c0_27 = arith.constant 0 : index
    %32 = vector.load %arg8[%c0_26, %c0_27] : memref<1x128xf32, #tpu.memory_space<vmem>>, vector<1x128xf32>
    tpu.vector_store %arg8[%c0_26, %c0_27], %31 {strides = array<i32>} : memref<1x128xf32, #tpu.memory_space<vmem>>, vector<1x128xf32>,
    %c0_28 = arith.constant 0 : index
    %c0_29 = arith.constant 0 : index
    %33 = vector.load %arg9[%c0_28, %c0_29] : memref<128x128xf32, #tpu.memory_space<vmem>>, vector<128x128xf32>
    %cst_30 = arith.constant dense<0.000000e+00> : vector<128x128xf32>
    %34 = tpu.matmul %3, %3, %cst_30 {dimension_numbers = #tpu.dot_dimension_numbers<[0], [0], [1], [1], [0, 1, 1, 1], [], []>} : vector<8x128xf32>, vector<8x128xf32>, vector<128x128xf32> -> vector<128x128xf32>
    %35 = arith.addf %33, %34 : vector<128x128xf32>
    %c0_31 = arith.constant 0 : index
    %c0_32 = arith.constant 0 : index
    %36 = vector.load %arg9[%c0_31, %c0_32] : memref<128x128xf32, #tpu.memory_space<vmem>>, vector<128x128xf32>
    tpu.vector_store %arg9[%c0_31, %c0_32], %35 {strides = array<i32>} : memref<128x128xf32, #tpu.memory_space<vmem>>, vector<128x128xf32>,
    %c0_33 = arith.constant 0 : index
    %c0_34 = arith.constant 0 : index
    %37 = vector.load %arg10[%c0_33, %c0_34] : memref<128x128xf32, #tpu.memory_space<vmem>>, vector<128x128xf32>
    %cst_35 = arith.constant dense<0.000000e+00> : vector<128x128xf32>
    %38 = tpu.matmul %4, %4, %cst_35 {dimension_numbers = #tpu.dot_dimension_numbers<[0], [0], [1], [1], [0, 1, 1, 1], [], []>} : vector<8x128xf32>, vector<8x128xf32>, vector<128x128xf32> -> vector<128x128xf32>
    %39 = arith.addf %37, %38 : vector<128x128xf32>
    %c0_36 = arith.constant 0 : index
    %c0_37 = arith.constant 0 : index
    %40 = vector.load %arg10[%c0_36, %c0_37] : memref<128x128xf32, #tpu.memory_space<vmem>>, vector<128x128xf32>
    tpu.vector_store %arg10[%c0_36, %c0_37], %39 {strides = array<i32>} : memref<128x128xf32, #tpu.memory_space<vmem>>, vector<128x128xf32>,
    %c0_i32_38 = arith.constant 0 : i32
    %41 = arith.cmpi eq, %arg0, %c0_i32_38 : i32
    %42 = arith.extui %41 : i1 to i32
    %c0_i32_39 = arith.constant 0 : i32
    %43 = arith.cmpi ne, %42, %c0_i32_39 : i32
    scf.if %43 {
      %c0_40 = arith.constant 0 : index
      %c0_41 = arith.constant 0 : index
      %44 = vector.load %arg4[%c0_40, %c0_41] : memref<1x128xf32, #tpu.memory_space<vmem>>, vector<1x128xf32>
      %cst_42 = arith.constant 1.250000e-01 : f32
      %45 = vector.broadcast %cst_42 : f32 to vector<1x128xf32>
      %46 = arith.mulf %44, %45 : vector<1x128xf32>
      %c0_43 = arith.constant 0 : index
      %c0_44 = arith.constant 0 : index
      %47 = vector.load %arg5[%c0_43, %c0_44] : memref<1x128xf32, #tpu.memory_space<vmem>>, vector<1x128xf32>
      %cst_45 = arith.constant 1.250000e-01 : f32
      %48 = vector.broadcast %cst_45 : f32 to vector<1x128xf32>
      %49 = arith.mulf %47, %48 : vector<1x128xf32>
      %c0_46 = arith.constant 0 : index
      %c0_47 = arith.constant 0 : index
      %50 = vector.load %arg6[%c0_46, %c0_47] : memref<1x128xf32, #tpu.memory_space<vmem>>, vector<1x128xf32>
      %cst_48 = arith.constant 1.250000e-01 : f32
      %51 = vector.broadcast %cst_48 : f32 to vector<1x128xf32>
      %52 = arith.mulf %50, %51 : vector<1x128xf32>
      %53 = arith.mulf %46, %46 : vector<1x128xf32>
      %54 = arith.subf %52, %53 : vector<1x128xf32>
      %cst_49 = arith.constant 0.000000e+00 : f32
      %55 = vector.broadcast %cst_49 : f32 to vector<1x128xf32>
      %56 = arith.maximumf %54, %55 : vector<1x128xf32>
      %c0_50 = arith.constant 0 : index
      %c0_51 = arith.constant 0 : index
      %57 = vector.load %arg7[%c0_50, %c0_51] : memref<1x128xf32, #tpu.memory_space<vmem>>, vector<1x128xf32>
      %cst_52 = arith.constant 1.250000e-01 : f32
      %58 = vector.broadcast %cst_52 : f32 to vector<1x128xf32>
      %59 = arith.mulf %57, %58 : vector<1x128xf32>
      %60 = arith.mulf %49, %49 : vector<1x128xf32>
      %61 = arith.subf %59, %60 : vector<1x128xf32>
      %cst_53 = arith.constant 0.000000e+00 : f32
      %62 = vector.broadcast %cst_53 : f32 to vector<1x128xf32>
      %63 = arith.maximumf %61, %62 : vector<1x128xf32>
      %cst_54 = arith.constant 9.99999974E-6 : f32
      %64 = vector.broadcast %cst_54 : f32 to vector<1x128xf32>
      %65 = arith.addf %56, %64 : vector<1x128xf32>
      %66 = math.rsqrt %65 : vector<1x128xf32>
      %cst_55 = arith.constant 1.250000e-01 : f32
      %67 = vector.broadcast %cst_55 : f32 to vector<1x128xf32>
      %68 = arith.mulf %66, %67 : vector<1x128xf32>
      %cst_56 = arith.constant 9.99999974E-6 : f32
      %69 = vector.broadcast %cst_56 : f32 to vector<1x128xf32>
      %70 = arith.addf %63, %69 : vector<1x128xf32>
      %71 = math.rsqrt %70 : vector<1x128xf32>
      %cst_57 = arith.constant 1.250000e-01 : f32
      %72 = vector.broadcast %cst_57 : f32 to vector<1x128xf32>
      %73 = arith.mulf %71, %72 : vector<1x128xf32>
      %c0_58 = arith.constant 0 : index
      %c0_59 = arith.constant 0 : index
      %74 = vector.load %arg6[%c0_58, %c0_59] : memref<1x128xf32, #tpu.memory_space<vmem>>, vector<1x128xf32>
      %cst_60 = arith.constant 8.000000e+00 : f32
      %75 = vector.broadcast %cst_60 : f32 to vector<1x128xf32>
      %76 = arith.mulf %75, %46 : vector<1x128xf32>
      %77 = arith.mulf %76, %46 : vector<1x128xf32>
      %78 = arith.subf %74, %77 : vector<1x128xf32>
      %c0_61 = arith.constant 0 : index
      %c0_62 = arith.constant 0 : index
      %79 = vector.load %arg7[%c0_61, %c0_62] : memref<1x128xf32, #tpu.memory_space<vmem>>, vector<1x128xf32>
      %cst_63 = arith.constant 8.000000e+00 : f32
      %80 = vector.broadcast %cst_63 : f32 to vector<1x128xf32>
      %81 = arith.mulf %80, %49 : vector<1x128xf32>
      %82 = arith.mulf %81, %49 : vector<1x128xf32>
      %83 = arith.subf %79, %82 : vector<1x128xf32>
      %c0_64 = arith.constant 0 : index
      %c0_65 = arith.constant 0 : index
      %84 = vector.load %arg8[%c0_64, %c0_65] : memref<1x128xf32, #tpu.memory_space<vmem>>, vector<1x128xf32>
      %cst_66 = arith.constant 8.000000e+00 : f32
      %85 = vector.broadcast %cst_66 : f32 to vector<1x128xf32>
      %86 = arith.mulf %85, %46 : vector<1x128xf32>
      %87 = arith.mulf %86, %49 : vector<1x128xf32>
      %88 = arith.subf %84, %87 : vector<1x128xf32>
      %89 = arith.mulf %68, %68 : vector<1x128xf32>
      %90 = arith.mulf %89, %78 : vector<1x128xf32>
      %91 = vector.shape_cast %90 : vector<1x128xf32> to vector<1x1x128xf32>
      %cst_67 = arith.constant dense<0.000000e+00> : vector<1xf32>
      %92 = vector.multi_reduction <add>, %91, %cst_67 [1, 2] : vector<1x1x128xf32> to vector<1xf32>
      %93 = vector.shape_cast %92 : vector<1xf32> to vector<1x1x1xf32>
      %94 = vector.extract %93[0, 0, 0] : f32 from vector<1x1x1xf32>
      %95 = arith.mulf %73, %73 : vector<1x128xf32>
      %96 = arith.mulf %95, %83 : vector<1x128xf32>
      %97 = vector.shape_cast %96 : vector<1x128xf32> to vector<1x1x128xf32>
      %cst_68 = arith.constant dense<0.000000e+00> : vector<1xf32>
      %98 = vector.multi_reduction <add>, %97, %cst_68 [1, 2] : vector<1x1x128xf32> to vector<1xf32>
      %99 = vector.shape_cast %98 : vector<1xf32> to vector<1x1x1xf32>
      %100 = vector.extract %99[0, 0, 0] : f32 from vector<1x1x1xf32>
      %101 = arith.mulf %68, %73 : vector<1x128xf32>
      %102 = arith.mulf %101, %88 : vector<1x128xf32>
      %103 = vector.shape_cast %102 : vector<1x128xf32> to vector<1x1x128xf32>
      %cst_69 = arith.constant dense<0.000000e+00> : vector<1xf32>
      %104 = vector.multi_reduction <add>, %103, %cst_69 [1, 2] : vector<1x1x128xf32> to vector<1xf32>
      %105 = vector.shape_cast %104 : vector<1xf32> to vector<1x1x1xf32>
      %106 = vector.extract %105[0, 0, 0] : f32 from vector<1x1x1xf32>
      %cst_70 = arith.constant 0.000000e+00 : f32
      %107 = vector.broadcast %cst_70 : f32 to vector<8x128xf32>
      %c0_71 = arith.constant 0 : index
      %c0_72 = arith.constant 0 : index
      %108 = vector.load %arg11[%c0_71, %c0_72] : memref<8x128xf32, #tpu.memory_space<vmem>>, vector<8x128xf32>
      tpu.vector_store %arg11[%c0_71, %c0_72], %107 {strides = array<i32>} : memref<8x128xf32, #tpu.memory_space<vmem>>, vector<8x128xf32>,
      %c0_73 = arith.constant 0 : index
      %c0_74 = arith.constant 0 : index
      %109 = vector.load %arg11[%c0_73, %c0_74] : memref<8x128xf32, #tpu.memory_space<vmem>>, vector<1x128xf32>
      tpu.vector_store %arg11[%c0_73, %c0_74], %46 {strides = array<i32>} : memref<8x128xf32, #tpu.memory_space<vmem>>, vector<1x128xf32>,
      %c0_75 = arith.constant 0 : index
      %c0_76 = arith.constant 0 : index
      %110 = vector.load %arg11[%c0_75, %c0_76] : memref<8x128xf32, #tpu.memory_space<vmem>>, vector<8x128xf32>
      %cst_77 = arith.constant dense<0.000000e+00> : vector<128x128xf32>
      %111 = tpu.matmul %110, %110, %cst_77 {dimension_numbers = #tpu.dot_dimension_numbers<[0], [0], [1], [1], [0, 1, 1, 1], [], []>} : vector<8x128xf32>, vector<8x128xf32>, vector<128x128xf32> -> vector<128x128xf32>
      %cst_78 = arith.constant 0.000000e+00 : f32
      %112 = vector.broadcast %cst_78 : f32 to vector<8x128xf32>
      %c0_79 = arith.constant 0 : index
      %c0_80 = arith.constant 0 : index
      %113 = vector.load %arg11[%c0_79, %c0_80] : memref<8x128xf32, #tpu.memory_space<vmem>>, vector<8x128xf32>
      tpu.vector_store %arg11[%c0_79, %c0_80], %112 {strides = array<i32>} : memref<8x128xf32, #tpu.memory_space<vmem>>, vector<8x128xf32>,
      %c0_81 = arith.constant 0 : index
      %c0_82 = arith.constant 0 : index
      %114 = vector.load %arg11[%c0_81, %c0_82] : memref<8x128xf32, #tpu.memory_space<vmem>>, vector<1x128xf32>
      tpu.vector_store %arg11[%c0_81, %c0_82], %68 {strides = array<i32>} : memref<8x128xf32, #tpu.memory_space<vmem>>, vector<1x128xf32>,
      %c0_83 = arith.constant 0 : index
      %c0_84 = arith.constant 0 : index
      %115 = vector.load %arg11[%c0_83, %c0_84] : memref<8x128xf32, #tpu.memory_space<vmem>>, vector<8x128xf32>
      %cst_85 = arith.constant dense<0.000000e+00> : vector<128x128xf32>
      %116 = tpu.matmul %115, %115, %cst_85 {dimension_numbers = #tpu.dot_dimension_numbers<[0], [0], [1], [1], [0, 1, 1, 1], [], []>} : vector<8x128xf32>, vector<8x128xf32>, vector<128x128xf32> -> vector<128x128xf32>
      %c0_86 = arith.constant 0 : index
      %c0_87 = arith.constant 0 : index
      %117 = vector.load %arg9[%c0_86, %c0_87] : memref<128x128xf32, #tpu.memory_space<vmem>>, vector<128x128xf32>
      %cst_88 = arith.constant 8.000000e+00 : f32
      %118 = vector.broadcast %cst_88 : f32 to vector<128x128xf32>
      %119 = arith.mulf %118, %111 : vector<128x128xf32>
      %120 = arith.subf %117, %119 : vector<128x128xf32>
      %121 = arith.mulf %120, %116 : vector<128x128xf32>
      %122 = arith.mulf %121, %121 : vector<128x128xf32>
      %123 = vector.shape_cast %122 : vector<128x128xf32> to vector<1x128x128xf32>
      %cst_89 = arith.constant dense<0.000000e+00> : vector<1xf32>
      %124 = vector.multi_reduction <add>, %123, %cst_89 [1, 2] : vector<1x128x128xf32> to vector<1xf32>
      %125 = vector.shape_cast %124 : vector<1xf32> to vector<1x1x1xf32>
      %126 = vector.extract %125[0, 0, 0] : f32 from vector<1x1x1xf32>
      %cst_90 = arith.constant 0.000000e+00 : f32
      %127 = vector.broadcast %cst_90 : f32 to vector<8x128xf32>
      %c0_91 = arith.constant 0 : index
      %c0_92 = arith.constant 0 : index
      %128 = vector.load %arg11[%c0_91, %c0_92] : memref<8x128xf32, #tpu.memory_space<vmem>>, vector<8x128xf32>
      tpu.vector_store %arg11[%c0_91, %c0_92], %127 {strides = array<i32>} : memref<8x128xf32, #tpu.memory_space<vmem>>, vector<8x128xf32>,
      %c0_93 = arith.constant 0 : index
      %c0_94 = arith.constant 0 : index
      %129 = vector.load %arg11[%c0_93, %c0_94] : memref<8x128xf32, #tpu.memory_space<vmem>>, vector<1x128xf32>
      tpu.vector_store %arg11[%c0_93, %c0_94], %49 {strides = array<i32>} : memref<8x128xf32, #tpu.memory_space<vmem>>, vector<1x128xf32>,
      %c0_95 = arith.constant 0 : index
      %c0_96 = arith.constant 0 : index
      %130 = vector.load %arg11[%c0_95, %c0_96] : memref<8x128xf32, #tpu.memory_space<vmem>>, vector<8x128xf32>
      %cst_97 = arith.constant dense<0.000000e+00> : vector<128x128xf32>
      %131 = tpu.matmul %130, %130, %cst_97 {dimension_numbers = #tpu.dot_dimension_numbers<[0], [0], [1], [1], [0, 1, 1, 1], [], []>} : vector<8x128xf32>, vector<8x128xf32>, vector<128x128xf32> -> vector<128x128xf32>
      %cst_98 = arith.constant 0.000000e+00 : f32
      %132 = vector.broadcast %cst_98 : f32 to vector<8x128xf32>
      %c0_99 = arith.constant 0 : index
      %c0_100 = arith.constant 0 : index
      %133 = vector.load %arg11[%c0_99, %c0_100] : memref<8x128xf32, #tpu.memory_space<vmem>>, vector<8x128xf32>
      tpu.vector_store %arg11[%c0_99, %c0_100], %132 {strides = array<i32>} : memref<8x128xf32, #tpu.memory_space<vmem>>, vector<8x128xf32>,
      %c0_101 = arith.constant 0 : index
      %c0_102 = arith.constant 0 : index
      %134 = vector.load %arg11[%c0_101, %c0_102] : memref<8x128xf32, #tpu.memory_space<vmem>>, vector<1x128xf32>
      tpu.vector_store %arg11[%c0_101, %c0_102], %73 {strides = array<i32>} : memref<8x128xf32, #tpu.memory_space<vmem>>, vector<1x128xf32>,
      %c0_103 = arith.constant 0 : index
      %c0_104 = arith.constant 0 : index
      %135 = vector.load %arg11[%c0_103, %c0_104] : memref<8x128xf32, #tpu.memory_space<vmem>>, vector<8x128xf32>
      %cst_105 = arith.constant dense<0.000000e+00> : vector<128x128xf32>
      %136 = tpu.matmul %135, %135, %cst_105 {dimension_numbers = #tpu.dot_dimension_numbers<[0], [0], [1], [1], [0, 1, 1, 1], [], []>} : vector<8x128xf32>, vector<8x128xf32>, vector<128x128xf32> -> vector<128x128xf32>
      %c0_106 = arith.constant 0 : index
      %c0_107 = arith.constant 0 : index
      %137 = vector.load %arg10[%c0_106, %c0_107] : memref<128x128xf32, #tpu.memory_space<vmem>>, vector<128x128xf32>
      %cst_108 = arith.constant 8.000000e+00 : f32
      %138 = vector.broadcast %cst_108 : f32 to vector<128x128xf32>
      %139 = arith.mulf %138, %131 : vector<128x128xf32>
      %140 = arith.subf %137, %139 : vector<128x128xf32>
      %141 = arith.mulf %140, %136 : vector<128x128xf32>
      %142 = arith.mulf %141, %141 : vector<128x128xf32>
      %143 = vector.shape_cast %142 : vector<128x128xf32> to vector<1x128x128xf32>
      %cst_109 = arith.constant dense<0.000000e+00> : vector<1xf32>
      %144 = vector.multi_reduction <add>, %143, %cst_109 [1, 2] : vector<1x128x128xf32> to vector<1xf32>
      %145 = vector.shape_cast %144 : vector<1xf32> to vector<1x1x1xf32>
      %146 = vector.extract %145[0, 0, 0] : f32 from vector<1x1x1xf32>
      %cst_110 = arith.constant 2.000000e+00 : f32
      %147 = arith.mulf %cst_110, %94 : f32
      %148 = arith.subf %126, %147 : f32
      %cst_111 = arith.constant 3.200000e+01 : f32
      %149 = arith.addf %148, %cst_111 : f32
      %cst_112 = arith.constant 2.000000e+00 : f32
      %150 = arith.mulf %cst_112, %100 : f32
      %151 = arith.subf %146, %150 : f32
      %cst_113 = arith.constant 3.200000e+01 : f32
      %152 = arith.addf %151, %cst_113 : f32
      %153 = arith.addf %94, %100 : f32
      %cst_114 = arith.constant 2.000000e+00 : f32
      %154 = arith.mulf %cst_114, %106 : f32
      %155 = arith.subf %153, %154 : f32
      %156 = arith.addf %152, %149 : f32
      %cst_115 = arith.constant 1.000000e-01 : f32
      %157 = arith.mulf %cst_115, %156 : f32
      %158 = arith.addf %155, %157 : f32
      %c0_116 = arith.constant 0 : index
      %c0_117 = arith.constant 0 : index
      %159 = memref.load %arg3[%c0_116, %c0_117] : memref<1x1xf32, #tpu.memory_space<smem>>
      memref.store %158, %arg3[%c0_116, %c0_117] : memref<1x1xf32, #tpu.memory_space<smem>>
    } else {
    }
    return
  }
  func.func @transform_0(%arg0: i32) -> (i32, i32) {
    %c0_i32 = arith.constant 0 : i32
    %c0_i32_0 = arith.constant 0 : i32
    return %arg0, %c0_i32 : i32, i32
  }
  func.func @transform_1(%arg0: i32) -> (i32, i32) {
    %c0_i32 = arith.constant 0 : i32
    %c0_i32_0 = arith.constant 0 : i32
    return %arg0, %c0_i32 : i32, i32
  }
  func.func @transform_2(%arg0: i32) -> (i32, i32) {
    %c0_i32 = arith.constant 0 : i32
    %c0_i32_0 = arith.constant 0 : i32
    %c0_i32_1 = arith.constant 0 : i32
    return %c0_i32, %c0_i32_0 : i32, i32
  }
}

</mosaic_0001>

<bundles_post_ra>
// kernel: tpu_custom_call.1
= control target key start
LH: loop header
LB: loop body
LE: loop exit
PB: predicated region body
PF: predicated region fallthrough
CT: control target
= control target key end

     0   :  { %7 = vsyncpa [#allocation11], 0  ;;  %s2794_s0 = inlined_call_operand.hbm [shape: f32[8,128], index: 0, kind: input, shape index: {}]   ;;  %s2795_s1 = inlined_call_operand.hbm [shape: f32[8,128], index: 1, kind: input, shape index: {}]   ;;  %s2796_s2 = inlined_call_operand.hbm [shape: f32[1,1], index: 2, kind: output, shape index: {}]  }
   0x1   :  { %8 = vsyncpa [#allocation14], 0 }
   0x2   :  { %9 = vsyncpa [#allocation12], 0  ;;  %s2324_s9 = smov [#allocation10]   ;;  %s2325_s11 = smov [#allocation13]  }
   0x3   :  { %s16_s10 = sshll.u32 %s2324_s9, 4  ;;  %s26_s12 = sshll.u32 %s2325_s11, 4  ;;  %s17_s10 = int_to_ptr.vmem [resolvable:$true] %s16_s10  ;;  %s27_s12 = int_to_ptr.vmem [resolvable:$true] %s26_s12 }
   0x4   :  { %s2264_s15 = scalar_lea.hbm %s2794_s0, 128 }
   0x5   :  { %p2265_p0 = scmp.ne.s32.totalorder %s2794_s0, %s2264_s15  ;;  %p2268_p1 = scmp.lt.u32.totalorder %s2264_s15, %s2794_s0 }
   0x7   :  { %p2270_p2 = pnand %p2268_p1, %p2265_p0 }
   0x9   :  { %2273 = shalt.err (!%p2270_p2)
}
   0xa   :  { %s2274_s20 = scalar_lea.vmem %s17_s10, 128  ;;  %p2279_p4 = scmp.lt.s32.totalorder %s17_s10, %s17_s10 }
   0xb   :  { %p2275_p3 = scmp.ne.s32.totalorder %s17_s10, %s2274_s20  ;;  %p2280_p5 = scmp.lt.s32.totalorder %s2274_s20, %s2274_s20 }
   0xd   :  { %p2281_p6 = por %p2280_p5, %p2279_p4 }
   0xf   :  { %p2282_p7 = pnand %p2281_p6, %p2275_p3 }
  0x11   :  { %2285 = shalt.err (!%p2282_p7)
}
  0x12   :  { %19 = dma.hbm_to_vmem [thread:$0]  %s2794_s0, 128, %s17_s10, [#allocation11]  }
  0x13   :  { %s2286_s25 = scalar_lea.hbm %s2795_s1, 128 }
  0x14   :  { %p2287_p8 = scmp.ne.s32.totalorder %s2795_s1, %s2286_s25  ;;  %p2290_p9 = scmp.lt.u32.totalorder %s2286_s25, %s2795_s1 }
  0x16   :  { %p2292_p10 = pnand %p2290_p9, %p2287_p8 }
  0x18   :  { %2295 = shalt.err (!%p2292_p10)
}
  0x19   :  { %s2296_s30 = scalar_lea.vmem %s27_s12, 128  ;;  %p2301_p12 = scmp.lt.s32.totalorder %s27_s12, %s27_s12 }
  0x1a   :  { %p2297_p11 = scmp.ne.s32.totalorder %s27_s12, %s2296_s30  ;;  %p2302_p13 = scmp.lt.s32.totalorder %s2296_s30, %s2296_s30 }
  0x1c   :  { %p2303_p0 = por %p2302_p13, %p2301_p12 }
  0x1e   :  { %p2304_p1 = pnand %p2303_p0, %p2297_p11 }
  0x20   :  { %2307 = shalt.err (!%p2304_p1)
}
  0x21   :  { %29 = dma.hbm_to_vmem [thread:$0]  %s2795_s1, 128, %s27_s12, [#allocation14]  }
  0x22   :  { %2318 = dma.done.wait [#allocation11], 128  }
  0x23   :  { %2319 = vsyncadd [#allocation11], 4294967168 }
  0x24   :  { %2320 = dma.done.wait [#allocation14], 128  }
  0x25   :  { %2321 = vsyncadd [#allocation14], 4294967168  ;;  %v2326_v0 = vmov 0.0   ;;  %v77_v1 = vld [vmem:[#allocation10] sm:$0xff]  ;;  %v2373_v2 = vld [vmem:[#allocation13] sm:$0xff]  ;;  %vm175_vm0 = vcmask 64512  }
  0x26   :  { %40 = vst [vmem:[#allocation2] sm:$0x1] %v2326_v0  ;;  %42 = vst [vmem:[#allocation4] sm:$0x1] %v2326_v0  ;;  %143 = vxpose.xlu0.b32.start.end [1/1] (short) %v77_v1, 128  ;;  %v80_v3 = vrot.slane %v77_v1, 4  ;;  %v98_v4 = vmul.f32 %v77_v1, %v77_v1  ;;  %v89_v5 = vrot.slane %v2373_v2, 4  ;;  %v108_v6 = vmul.f32 %v2373_v2, %v2373_v2 }
  0x27   :  { %41 = vst [vmem:[#allocation3] sm:$0x1] %v2326_v0  ;;  %43 = vst [vmem:[#allocation5] sm:$0x1] %v2326_v0  ;;  %2090 = vmatprep.subr.mxu0 %v77_v1  ;;  %v118_v7 = vmul.f32 %v2373_v2, %v77_v1  ;;  %2116 = vmatprep.subr.mxu1 %v2373_v2  ;;  %vm708_vm1 = vcmask 1040384   ;;  %s2308_s22 = scalar_lea.hbm %s2796_s2, 16 }
  0x28   :  { %44 = vst [vmem:[#allocation6] sm:$0x1] %v2326_v0  ;;  %743 = vst [vmem:[#allocation9] sm:$0xff] %v2326_v0  ;;  %2091 = vmatpush3.msra.mxu0 %v77_v1  ;;  %v81_v8 = vadd.f32 %v80_v3, %v77_v1  ;;  %v99_v9 = vrot.slane %v98_v4, 4  ;;  %v90_v10 = vadd.f32 %v89_v5, %v2373_v2  ;;  %v109_v11 = vrot.slane %v108_v6, 4  ;;  %p2309_p2 = scmp.ne.s32.totalorder %s2796_s2, %s2308_s22  ;;  %p2312_p3 = scmp.lt.u32.totalorder %s2308_s22, %s2796_s2 }
  0x29   :  { %2117 = vmatpush3.msra.mxu1 %v2373_v2  ;;  %v119_v12 = vrot.slane %v118_v7, 4 }
  0x2a   :  { %v82_v13 = vrot.slane %v81_v8, 2  ;;  %v100_v14 = vadd.f32 %v99_v9, %v98_v4  ;;  %v91_v15 = vrot.slane %v90_v10, 2  ;;  %v110_v16 = vadd.f32 %v109_v11, %v108_v6  ;;  %p2314_p4 = pnand %p2312_p3, %p2309_p2 }
  0x2b   :  { %v120_v17 = vadd.f32 %v119_v12, %v118_v7 }
  0x2c   :  { %v83_v18 = vadd.f32 %v82_v13, %v81_v8  ;;  %v101_v19 = vrot.slane %v100_v14, 2  ;;  %v92_v20 = vadd.f32 %v91_v15, %v90_v10  ;;  %v111_v21 = vrot.slane %v110_v16, 2 }
  0x2d   :  { %v121_v22 = vrot.slane %v120_v17, 2  ;;  %v79_v27 = vld [vmem:[#allocation2] sm:$0x1]  ;;  %v97_v34 = vld [vmem:[#allocation4] sm:$0x1] }
  0x2e   :  { %v84_v23 = vrot.slane %v83_v18, 1  ;;  %v102_v24 = vadd.f32 %v101_v19, %v100_v14  ;;  %v93_v25 = vrot.slane %v92_v20, 1  ;;  %v112_v26 = vadd.f32 %v111_v21, %v110_v16  ;;  %v88_v28 = vld [vmem:[#allocation3] sm:$0x1]  ;;  %v107_v35 = vld [vmem:[#allocation5] sm:$0x1] }
  0x2f   :  { %v122_v29 = vadd.f32 %v121_v22, %v120_v17  ;;  %v117_v41 = vld [vmem:[#allocation6] sm:$0x1] }
  0x30   :  { %v85_v30 = vadd.f32 %v84_v23, %v83_v18  ;;  %v103_v31 = vrot.slane %v102_v24, 1  ;;  %v94_v32 = vadd.f32 %v93_v25, %v92_v20  ;;  %v113_v33 = vrot.slane %v112_v26, 1 }
  0x31   :  { %v123_v36 = vrot.slane %v122_v29, 1 }
  0x32   :  { %v86_v37 = vadd.f32 %v85_v30, %v79_v27  ;;  %v104_v38 = vadd.f32 %v103_v31, %v102_v24  ;;  %v114_v39 = vadd.f32 %v113_v33, %v112_v26  ;;  %v95_v40 = vadd.f32 %v94_v32, %v88_v28 }
  0x33   :  { %v124_v42 = vadd.f32 %v123_v36, %v122_v29 }
  0x34   :  { %87 = vst [vmem:[#allocation2] sm:$0x1] %v86_v37  ;;  %v105_v43 = vadd.f32 %v104_v38, %v97_v34  ;;  %96 = vst [vmem:[#allocation3] sm:$0x1] %v95_v40  ;;  %v115_v44 = vadd.f32 %v114_v39, %v107_v35 }
  0x35   :  { %v125_v45 = vadd.f32 %v124_v42, %v117_v41 }
  0x36   :  { %106 = vst [vmem:[#allocation4] sm:$0x1] %v105_v43  ;;  %116 = vst [vmem:[#allocation5] sm:$0x1] %v115_v44 }
  0x37   :  { %126 = vst [vmem:[#allocation6] sm:$0x1] %v125_v45 }
  0x3b   :  { %v677_v46 = vld [vmem:[#allocation2] sm:$0x1]  ;;  %v679_v51 = vld [vmem:[#allocation3] sm:$0x1] }
  0x3c   :  { %v2382_v47 = vmul.f32 0.125, %v677_v46  ;;  %v2392_v55 = vmul.f32 0.125, %v679_v51 }
  0x3d   :  { %v2384_v48 = vld [vmem:[#allocation4] sm:$0x1]  ;;  %v2390_v53 = vld [vmem:[#allocation5] sm:$0x1] }
  0x3e   :  { %v682_v49 = vmul.f32 0.125, %v2384_v48  ;;  %744 = vst [vmem:[#allocation9] sm:$0x1] %v2382_v47  ;;  %v683_v50 = vmul.f32 %v2382_v47, %v2382_v47  ;;  %v687_v57 = vmul.f32 0.125, %v2390_v53  ;;  %v688_v58 = vmul.f32 %v2392_v55, %v2392_v55 }
  0x40   :  { %v684_v52 = vsub.f32 %v682_v49, %v683_v50  ;;  %v689_v60 = vsub.f32 %v687_v57, %v688_v58 }
  0x42   :  { %v685_v54 = vmax.f32 %v684_v52, 0.0  ;;  %v690_v61 = vmax.f32 %v689_v60, 0.0 }
  0x44   :  { %v691_v56 = vadd.f32 1e-05, %v685_v54  ;;  %v694_v63 = vadd.f32 1e-05, %v690_v61 }
  0x45   :  { %v745_v59 = vld [vmem:[#allocation9] sm:$0xff] }
  0x46   :  { %746 = vxpose.xlu1.b32.start.end [1/1] (short) %v745_v59, 128  ;;  %2260 = vrsqrt.f32 %v691_v56  ;;  %971 = vst [vmem:[#allocation9] sm:$0xff] %v2326_v0  ;;  %2142 = vmatprep.subr.mxu0 %v745_v59 }
  0x47   :  { %2262 = vrsqrt.f32 %v694_v63 }
  0x50   :  { %v2261_v62 = vpop.eup %2260 }
  0x51   :  { %v2398_v1 = vmul.f32 0.125, %v2261_v62  ;;  %v2263_v4 = vpop.eup %2262 }
  0x52   :  { %v2406_v5 = vmul.f32 0.125, %v2263_v4 }
  0x53   :  { %972 = vst [vmem:[#allocation9] sm:$0x1] %v2398_v1 }
  0x5a   :  { %v2401_v3 = vld [vmem:[#allocation9] sm:$0xff] }
  0x5b   :  { %1303 = vst [vmem:[#allocation9] sm:$0xff] %v2326_v0  ;;  %2168 = vmatprep.subr.mxu1 %v2401_v3 }
  0x5c   :  { %1304 = vst [vmem:[#allocation9] sm:$0x1] %v2392_v55 }
  0x63   :  { %417 = vxpose.xlu0.b32.start.end [1/1] (short) %v2373_v2, 128  ;;  %v1305_v6 = vld [vmem:[#allocation9] sm:$0xff] }
  0x64   :  { %1531 = vst [vmem:[#allocation9] sm:$0xff] %v2326_v0 }
  0x65   :  { %1532 = vst [vmem:[#allocation9] sm:$0x1] %v2406_v5 }
  0x6c   :  { %v2418_v11 = vld [vmem:[#allocation9] sm:$0xff] }
  0x83   :  { %974 = vxpose.xlu1.b32.start.end [1/1] (short) %v2401_v3, 128 }
  0xa0   :  { %1306 = vxpose.xlu0.b32.start.end [1/1] (short) %v1305_v6, 128 }
  0xa6   :  { %v159_v7 = vpop.trf.xlu0 }
  0xa7   :  { %2092 = vmatprep.mubr.msk.f32.mxu0 %vm175_vm0, %v159_v7 }
  0xaa   :  { %v160_v8 = vpop.trf.xlu0 }
  0xab   :  { %2093 = vmatmul.mubr.msk.f32.vlgmr.msra.gmra.mrb[0].mxu0 %vm175_vm0, %v160_v8 }
  0xac   :  { %2143 = vmatpush3.msra.mxu0 %v745_v59 }
  0xad   :  { %2194 = vmatprep.subr.mxu0 %v1305_v6 }
  0xae   :  { %v161_v9 = vpop.trf.xlu0 }
  0xaf   :  { %2095 = vmatprep.mubr.msk.f32.mxu0 %vm175_vm0, %v161_v9 }
  0xb2   :  { %v162_v2 = vpop.trf.xlu0 }
  0xb3   :  { %2096 = vmatmul.mubr.msk.f32.gmra.mrb[2].mxu0 %vm175_vm0, %v162_v2 }
  0xb6   :  { %v163_v0 = vpop.trf.xlu0 }
  0xb7   :  { %2098 = vmatprep.mubr.msk.f32.mxu0 %vm175_vm0, %v163_v0 }
  0xba   :  { %v164_v10 = vpop.trf.xlu0 }
  0xbb   :  { %2099 = vmatmul.mubr.msk.f32.gmra.mrb[4].mxu0 %vm175_vm0, %v164_v10 }
  0xbe   :  { %v165_v12 = vpop.trf.xlu0 }
  0xbf   :  { %2101 = vmatprep.mubr.msk.f32.mxu0 %vm175_vm0, %v165_v12 }
  0xc0   :  { %1534 = vxpose.xlu1.b32.start.end [1/1] (short) %v2418_v11, 128 }
  0xc2   :  { %v166_v13 = vpop.trf.xlu0 }
  0xc3   :  { %2102 = vmatmul.mubr.msk.f32.gmra.mrb[6].mxu0 %vm175_vm0, %v166_v13 }
  0xc6   :  { %v167_v14 = vpop.trf.xlu0  ;;  %v762_v15 = vpop.trf.xlu1 }
  0xc7   :  { %2104 = vmatprep.mubr.msk.f32.mxu0 %vm175_vm0, %v167_v14 }
  0xca   :  { %v168_v16 = vpop.trf.xlu0  ;;  %v763_v17 = vpop.trf.xlu1 }
  0xcb   :  { %2105 = vmatmul.mubr.msk.f32.gmra.mrb[8].mxu0 %vm175_vm0, %v168_v16 }
  0xce   :  { %v169_v18 = vpop.trf.xlu0  ;;  %v764_v19 = vpop.trf.xlu1 }
  0xcf   :  { %2107 = vmatprep.mubr.msk.f32.mxu0 %vm175_vm0, %v169_v18 }
  0xd2   :  { %v170_v20 = vpop.trf.xlu0  ;;  %v765_v21 = vpop.trf.xlu1 }
  0xd3   :  { %2108 = vmatmul.mubr.msk.f32.gmra.mrb[10].mxu0 %vm175_vm0, %v170_v20 }
  0xd6   :  { %v171_v22 = vpop.trf.xlu0  ;;  %v766_v23 = vpop.trf.xlu1 }
  0xd7   :  { %2110 = vmatprep.mubr.msk.f32.mxu0 %vm175_vm0, %v171_v22 }
  0xda   :  { %v172_v24 = vpop.trf.xlu0  ;;  %v767_v25 = vpop.trf.xlu1 }
  0xdb   :  { %2111 = vmatmul.mubr.msk.f32.gmra.mrb[12].mxu0 %vm175_vm0, %v172_v24 }
  0xde   :  { %v173_v26 = vpop.trf.xlu0  ;;  %v768_v27 = vpop.trf.xlu1 }
  0xdf   :  { %2113 = vmatprep.mubr.msk.f32.mxu0 %vm175_vm0, %v173_v26 }
  0xe2   :  { %v174_v28 = vpop.trf.xlu0  ;;  %v769_v29 = vpop.trf.xlu1 }
  0xe3   :  { %2114 = vmatmul.mubr.msk.f32.gmra.mrb[14].mxu0 %vm175_vm0, %v174_v28 }
  0xe4   :  { %2144 = vmatprep.mubr.msk.f32.mxu0 %vm175_vm0, %v762_v15 }
  0xe6   :  { %v433_v30 = vpop.trf.xlu0  ;;  %v770_v31 = vpop.trf.xlu1 }
  0xe7   :  { %2145 = vmatmul.mubr.msk.f32.vlgmr.msra.gmra.mrb[16].mxu0 %vm175_vm0, %v763_v17  ;;  %2118 = vmatprep.mubr.msk.f32.mxu1 %vm175_vm0, %v433_v30 }
  0xe8   :  { %2147 = vmatprep.mubr.msk.f32.mxu0 %vm175_vm0, %v764_v19  ;;  %2195 = vmatpush3.msra.mxu0 %v1305_v6 }
  0xea   :  { %v434_v32 = vpop.trf.xlu0  ;;  %v771_v33 = vpop.trf.xlu1 }
  0xeb   :  { %2148 = vmatmul.mubr.msk.f32.gmra.mrb[18].mxu0 %vm175_vm0, %v765_v21  ;;  %2119 = vmatmul.mubr.msk.f32.vlgmr.msra.gmra.mrb[0].mxu1 %vm175_vm0, %v434_v32 }
  0xec   :  { %2150 = vmatprep.mubr.msk.f32.mxu0 %vm175_vm0, %v766_v23  ;;  %2169 = vmatpush3.msra.mxu1 %v2401_v3 }
  0xed   :  { %2220 = vmatprep.subr.mxu1 %v2418_v11 }
  0xee   :  { %v435_v34 = vpop.trf.xlu0  ;;  %v772_v35 = vpop.trf.xlu1 }
  0xef   :  { %2151 = vmatmul.mubr.msk.f32.gmra.mrb[20].mxu0 %vm175_vm0, %v767_v25  ;;  %2121 = vmatprep.mubr.msk.f32.mxu1 %vm175_vm0, %v435_v34 }
  0xf0   :  { %2153 = vmatprep.mubr.msk.f32.mxu0 %vm175_vm0, %v768_v27 }
  0xf2   :  { %v436_v36 = vpop.trf.xlu0  ;;  %v773_v37 = vpop.trf.xlu1 }
  0xf3   :  { %2154 = vmatmul.mubr.msk.f32.gmra.mrb[22].mxu0 %vm175_vm0, %v769_v29  ;;  %2122 = vmatmul.mubr.msk.f32.gmra.mrb[2].mxu1 %vm175_vm0, %v436_v36 }
  0xf4   :  { %2156 = vmatprep.mubr.msk.f32.mxu0 %vm175_vm0, %v770_v31 }
  0xf6   :  { %v437_v38 = vpop.trf.xlu0  ;;  %v774_v39 = vpop.trf.xlu1 }
  0xf7   :  { %2157 = vmatmul.mubr.msk.f32.gmra.mrb[24].mxu0 %vm175_vm0, %v771_v33  ;;  %2124 = vmatprep.mubr.msk.f32.mxu1 %vm175_vm0, %v437_v38 }
  0xf8   :  { %2159 = vmatprep.mubr.msk.f32.mxu0 %vm175_vm0, %v772_v35 }
  0xfa   :  { %v438_v40 = vpop.trf.xlu0  ;;  %v775_v41 = vpop.trf.xlu1 }
  0xfb   :  { %2160 = vmatmul.mubr.msk.f32.gmra.mrb[26].mxu0 %vm175_vm0, %v773_v37  ;;  %2125 = vmatmul.mubr.msk.f32.gmra.mrb[4].mxu1 %vm175_vm0, %v438_v40 }
  0xfc   :  { %2162 = vmatprep.mubr.msk.f32.mxu0 %vm175_vm0, %v774_v39 }
  0xfe   :  { %v439_v42 = vpop.trf.xlu0  ;;  %v776_v43 = vpop.trf.xlu1 }
  0xff   :  { %2163 = vmatmul.mubr.msk.f32.gmra.mrb[28].mxu0 %vm175_vm0, %v775_v41  ;;  %2127 = vmatprep.mubr.msk.f32.mxu1 %vm175_vm0, %v439_v42 }
 0x100   :  { %2165 = vmatprep.mubr.msk.f32.mxu0 %vm175_vm0, %v776_v43 }
 0x102   :  { %v440_v44 = vpop.trf.xlu0  ;;  %v777_v45 = vpop.trf.xlu1 }
 0x103   :  { %2166 = vmatmul.mubr.msk.f32.gmra.mrb[30].mxu0 %vm175_vm0, %v777_v45  ;;  %2128 = vmatmul.mubr.msk.f32.gmra.mrb[6].mxu1 %vm175_vm0, %v440_v44 }
 0x106   :  { %v441_v46 = vpop.trf.xlu0  ;;  %v990_v49 = vpop.trf.xlu1 }
 0x107   :  { %2130 = vmatprep.mubr.msk.f32.mxu1 %vm175_vm0, %v441_v46 }
 0x10a   :  { %v442_v50 = vpop.trf.xlu0  ;;  %v991_v51 = vpop.trf.xlu1 }
 0x10b   :  { %2131 = vmatmul.mubr.msk.f32.gmra.mrb[8].mxu1 %vm175_vm0, %v442_v50 }
 0x10e   :  { %v443_v52 = vpop.trf.xlu0  ;;  %v992_v54 = vpop.trf.xlu1 }
 0x10f   :  { %2133 = vmatprep.mubr.msk.f32.mxu1 %vm175_vm0, %v443_v52  ;;  %v700_v52 = vmul.f32 8.0, %v2392_v55 }
 0x112   :  { %v444_v56 = vpop.trf.xlu0  ;;  %v993_v57 = vpop.trf.xlu1 }
 0x113   :  { %2134 = vmatmul.mubr.msk.f32.gmra.mrb[10].mxu1 %vm175_vm0, %v444_v56 }
 0x116   :  { %v445_v58 = vpop.trf.xlu0  ;;  %v994_v59 = vpop.trf.xlu1 }
 0x117   :  { %2136 = vmatprep.mubr.msk.f32.mxu1 %vm175_vm0, %v445_v58  ;;  %v697_v58 = vmul.f32 8.0, %v2382_v47 }
 0x11a   :  { %v446_v60 = vpop.trf.xlu0  ;;  %v995_v61 = vpop.trf.xlu1 }
 0x11b   :  { %2137 = vmatmul.mubr.msk.f32.gmra.mrb[12].mxu1 %vm175_vm0, %v446_v60  ;;  %v704_v60 = vmul.f32 %v697_v58, %v2392_v55 }
 0x11e   :  { %v447_v62 = vpop.trf.xlu0  ;;  %v996_v63 = vpop.trf.xlu1 }
 0x11f   :  { %2139 = vmatprep.mubr.msk.f32.mxu1 %vm175_vm0, %v447_v62  ;;  %v703_v62 = vld [vmem:[#allocation6] sm:$0x1] }
 0x122   :  { %v448_v3 = vpop.trf.xlu0  ;;  %v997_v4 = vpop.trf.xlu1 }
 0x123   :  { %2140 = vmatmul.mubr.msk.f32.gmra.mrb[14].mxu1 %vm175_vm0, %v448_v3 }
 0x124   :  { %2170 = vmatprep.mubr.msk.f32.mxu1 %vm175_vm0, %v990_v49 }
 0x126   :  { %v998_v6 = vpop.trf.xlu1  ;;  %v1322_v7 = vpop.trf.xlu0 }
 0x127   :  { %2171 = vmatmul.mubr.msk.f32.vlgmr.msra.gmra.mrb[16].mxu1 %vm175_vm0, %v991_v51  ;;  %2196 = vmatprep.mubr.msk.f32.mxu0 %vm175_vm0, %v1322_v7 }
 0x128   :  { %2173 = vmatprep.mubr.msk.f32.mxu1 %vm175_vm0, %v992_v54  ;;  %2221 = vmatpush3.msra.mxu1 %v2418_v11  ;;  %v701_v54 = vmul.f32 %v700_v52, %v2392_v55  ;;  %v706_v55 = vmul.f32 %v2398_v1, %v2398_v1 }
 0x12a   :  { %v999_v8 = vpop.trf.xlu1  ;;  %v1323_v9 = vpop.trf.xlu0  ;;  %v702_v56 = vsub.f32 %v2390_v53, %v701_v54  ;;  %v698_v53 = vmul.f32 %v697_v58, %v2382_v47 }
 0x12b   :  { %2174 = vmatmul.mubr.msk.f32.gmra.mrb[18].mxu1 %vm175_vm0, %v993_v57  ;;  %2197 = vmatmul.mubr.msk.f32.vlgmr.msra.gmra.mrb[32].mxu0 %vm175_vm0, %v1323_v9  ;;  %v719_v57 = vmul.f32 %v2406_v5, %v2406_v5 }
 0x12c   :  { %2176 = vmatprep.mubr.msk.f32.mxu1 %vm175_vm0, %v994_v59 }
 0x12d   :  { %v720_v59 = vmul.f32 %v719_v57, %v702_v56 }
 0x12e   :  { %v1000_v2 = vpop.trf.xlu1  ;;  %v1324_v0 = vpop.trf.xlu0 }
 0x12f   :  { %2177 = vmatmul.mubr.msk.f32.gmra.mrb[20].mxu1 %vm175_vm0, %v995_v61  ;;  %2199 = vmatprep.mubr.msk.f32.mxu0 %vm175_vm0, %v1324_v0  ;;  %v721_v3 = vsel %vm708_vm1, %v720_v59, 0.0 }
 0x130   :  { %2179 = vmatprep.mubr.msk.f32.mxu1 %vm175_vm0, %v996_v63  ;;  %722 = vadd.xlane.f32.xlu1 %v721_v3 }
 0x132   :  { %v1001_v10 = vpop.trf.xlu1  ;;  %v1325_v12 = vpop.trf.xlu0 }
 0x133   :  { %2180 = vmatmul.mubr.msk.f32.gmra.mrb[22].mxu1 %vm175_vm0, %v997_v4  ;;  %2200 = vmatmul.mubr.msk.f32.gmra.mrb[34].mxu0 %vm175_vm0, %v1325_v12  ;;  %v705_v4 = vsub.f32 %v703_v62, %v704_v60 }
 0x134   :  { %2182 = vmatprep.mubr.msk.f32.mxu1 %vm175_vm0, %v998_v6  ;;  %v731_v6 = vmul.f32 %v2406_v5, %v2398_v1 }
 0x136   :  { %v1002_v11 = vpop.trf.xlu1  ;;  %v1326_v13 = vpop.trf.xlu0  ;;  %v732_v7 = vmul.f32 %v731_v6, %v705_v4 }
 0x137   :  { %2183 = vmatmul.mubr.msk.f32.gmra.mrb[24].mxu1 %vm175_vm0, %v999_v8  ;;  %2202 = vmatprep.mubr.msk.f32.mxu0 %vm175_vm0, %v1326_v13  ;;  %v699_v8 = vsub.f32 %v2384_v48, %v698_v53 }
 0x138   :  { %2185 = vmatprep.mubr.msk.f32.mxu1 %vm175_vm0, %v1000_v2  ;;  %v733_v9 = vsel %vm708_vm1, %v732_v7, 0.0 }
 0x139   :  { %v707_v2 = vmul.f32 %v706_v55, %v699_v8  ;;  %734 = vadd.xlane.f32.xlu1 %v733_v9 }
 0x13a   :  { %v1003_v14 = vpop.trf.xlu1  ;;  %v1327_v15 = vpop.trf.xlu0 }
 0x13b   :  { %2186 = vmatmul.mubr.msk.f32.gmra.mrb[26].mxu1 %vm175_vm0, %v1001_v10  ;;  %2203 = vmatmul.mubr.msk.f32.gmra.mrb[36].mxu0 %vm175_vm0, %v1327_v15  ;;  %v709_v0 = vsel %vm708_vm1, %v707_v2, 0.0 }
 0x13c   :  { %2188 = vmatprep.mubr.msk.f32.mxu1 %vm175_vm0, %v1002_v11  ;;  %710 = vadd.xlane.f32.xlu0 %v709_v0 }
 0x13e   :  { %v1004_v16 = vpop.trf.xlu1  ;;  %v1328_v17 = vpop.trf.xlu0 }
 0x13f   :  { %2189 = vmatmul.mubr.msk.f32.gmra.mrb[28].mxu1 %vm175_vm0, %v1003_v14  ;;  %2205 = vmatprep.mubr.msk.f32.mxu0 %vm175_vm0, %v1328_v17 }
 0x140   :  { %2191 = vmatprep.mubr.msk.f32.mxu1 %vm175_vm0, %v1004_v16 }
 0x142   :  { %v1005_v18 = vpop.trf.xlu1  ;;  %v1329_v19 = vpop.trf.xlu0 }
 0x143   :  { %2192 = vmatmul.mubr.msk.f32.gmra.mrb[30].mxu1 %vm175_vm0, %v1005_v18  ;;  %2206 = vmatmul.mubr.msk.f32.gmra.mrb[38].mxu0 %vm175_vm0, %v1329_v19 }
 0x146   :  { %v1330_v20 = vpop.trf.xlu0  ;;  %v1550_v21 = vpop.trf.xlu1 }
 0x147   :  { %2222 = vmatprep.mubr.msk.f32.mxu1 %vm175_vm0, %v1550_v21  ;;  %2208 = vmatprep.mubr.msk.f32.mxu0 %vm175_vm0, %v1330_v20 }
 0x14a   :  { %v1331_v22 = vpop.trf.xlu0  ;;  %v1551_v23 = vpop.trf.xlu1 }
 0x14b   :  { %2209 = vmatmul.mubr.msk.f32.gmra.mrb[40].mxu0 %vm175_vm0, %v1331_v22  ;;  %2223 = vmatmul.mubr.msk.f32.vlgmr.msra.gmra.mrb[32].mxu1 %vm175_vm0, %v1551_v23 }
 0x14e   :  { %v1332_v24 = vpop.trf.xlu0  ;;  %v1552_v25 = vpop.trf.xlu1 }
 0x14f   :  { %2225 = vmatprep.mubr.msk.f32.mxu1 %vm175_vm0, %v1552_v25  ;;  %2211 = vmatprep.mubr.msk.f32.mxu0 %vm175_vm0, %v1332_v24 }
 0x152   :  { %v1333_v26 = vpop.trf.xlu0  ;;  %v1553_v27 = vpop.trf.xlu1 }
 0x153   :  { %2212 = vmatmul.mubr.msk.f32.gmra.mrb[42].mxu0 %vm175_vm0, %v1333_v26  ;;  %2226 = vmatmul.mubr.msk.f32.gmra.mrb[34].mxu1 %vm175_vm0, %v1553_v27 }
 0x156   :  { %v1334_v28 = vpop.trf.xlu0  ;;  %v1554_v29 = vpop.trf.xlu1 }
 0x157   :  { %2228 = vmatprep.mubr.msk.f32.mxu1 %vm175_vm0, %v1554_v29  ;;  %2214 = vmatprep.mubr.msk.f32.mxu0 %vm175_vm0, %v1334_v28 }
 0x15a   :  { %v1335_v30 = vpop.trf.xlu0  ;;  %v1555_v31 = vpop.trf.xlu1 }
 0x15b   :  { %2215 = vmatmul.mubr.msk.f32.gmra.mrb[44].mxu0 %vm175_vm0, %v1335_v30  ;;  %2229 = vmatmul.mubr.msk.f32.gmra.mrb[36].mxu1 %vm175_vm0, %v1555_v31 }
 0x15e   :  { %v1336_v32 = vpop.trf.xlu0  ;;  %v1556_v33 = vpop.trf.xlu1 }
 0x15f   :  { %2231 = vmatprep.mubr.msk.f32.mxu1 %vm175_vm0, %v1556_v33  ;;  %2217 = vmatprep.mubr.msk.f32.mxu0 %vm175_vm0, %v1336_v32 }
 0x162   :  { %v1337_v34 = vpop.trf.xlu0  ;;  %v1557_v35 = vpop.trf.xlu1 }
 0x163   :  { %2218 = vmatmul.mubr.msk.f32.gmra.mrb[46].mxu0 %vm175_vm0, %v1337_v34  ;;  %2232 = vmatmul.mubr.msk.f32.gmra.mrb[38].mxu1 %vm175_vm0, %v1557_v35 }
 0x166   :  { %v1558_v36 = vpop.trf.xlu1 }
 0x167   :  { %2234 = vmatprep.mubr.msk.f32.mxu1 %vm175_vm0, %v1558_v36 }
 0x16a   :  { %v1559_v37 = vpop.trf.xlu1 }
 0x16b   :  { %2235 = vmatmul.mubr.msk.f32.gmra.mrb[40].mxu1 %vm175_vm0, %v1559_v37 }
 0x16e   :  { %v1560_v38 = vpop.trf.xlu1 }
 0x16f   :  { %2237 = vmatprep.mubr.msk.f32.mxu1 %vm175_vm0, %v1560_v38 }
 0x172   :  { %v1561_v39 = vpop.trf.xlu1 }
 0x173   :  { %2238 = vmatmul.mubr.msk.f32.gmra.mrb[42].mxu1 %vm175_vm0, %v1561_v39 }
 0x176   :  { %v1562_v40 = vpop.trf.xlu1 }
 0x177   :  { %2240 = vmatprep.mubr.msk.f32.mxu1 %vm175_vm0, %v1562_v40 }
 0x17a   :  { %v1563_v41 = vpop.trf.xlu1 }
 0x17b   :  { %2241 = vmatmul.mubr.msk.f32.gmra.mrb[44].mxu1 %vm175_vm0, %v1563_v41 }
 0x17e   :  { %v1564_v42 = vpop.trf.xlu1  ;;  %v2512_v43 = vpop.f32.mrb[0].mxu0 }
 0x17f   :  { %2243 = vmatprep.mubr.msk.f32.mxu1 %vm175_vm0, %v1564_v42  ;;  %v2515_v44 = vpop.f32.mrb[1].mxu0 }
 0x182   :  { %v1565_v45 = vpop.trf.xlu1 }
 0x183   :  { %2244 = vmatmul.mubr.msk.f32.gmra.mrb[46].mxu1 %vm175_vm0, %v1565_v45 }
 0x186   :  { %v2518_v46 = vpop.f32.mrb[2].mxu0 }
 0x187   :  { %v2520_v49 = vpop.f32.mrb[3].mxu0 }
 0x18e   :  { %v2522_v50 = vpop.f32.mrb[4].mxu0 }
 0x18f   :  { %v2524_v51 = vpop.f32.mrb[5].mxu0 }
 0x196   :  { %v2533_v61 = vpop.f32.mrb[6].mxu0 }
 0x197   :  { %v2535_v63 = vpop.f32.mrb[7].mxu0 }
 0x19e   :  { %v2543_v10 = vpop.f32.mrb[8].mxu0 }
 0x19f   :  { %v2545_v12 = vpop.f32.mrb[9].mxu0 }
 0x1a6   :  { %v2547_v11 = vpop.f32.mrb[10].mxu0 }
 0x1a7   :  { %v2549_v5 = vpop.f32.mrb[11].mxu0 }
 0x1ae   :  { %v2551_v47 = vpop.f32.mrb[12].mxu0 }
 0x1af   :  { %v2553_v13 = vpop.f32.mrb[13].mxu0 }
 0x1b6   :  { %v2555_v48 = vpop.f32.mrb[14].mxu0 }
 0x1b7   :  { %v2557_v1 = vpop.f32.mrb[15].mxu0 }
 0x1ba   :  { %v2146_v14 = vpop.f32.mrb[16].mxu0 }
 0x1bb   :  { %v2559_v15 = vmul.f32 8.0, %v2146_v14  ;;  %v892_v16 = vpop.f32.mrb[17].mxu0 }
 0x1bc   :  { %v2561_v17 = vmul.f32 8.0, %v892_v16 }
 0x1bd   :  { %v1232_v18 = vsub.f32 %v2512_v43, %v2559_v15 }
 0x1be   :  { %v2149_v19 = vpop.f32.mrb[18].mxu0  ;;  %v2565_v20 = vpop.f32.mrb[0].mxu1  ;;  %v1231_v21 = vsub.f32 %v2515_v44, %v2561_v17 }
 0x1bf   :  { %v2569_v22 = vmul.f32 8.0, %v2149_v19  ;;  %v902_v23 = vpop.f32.mrb[19].mxu0  ;;  %v2571_v24 = vpop.f32.mrb[1].mxu1 }
 0x1c0   :  { %v2573_v25 = vmul.f32 8.0, %v902_v23 }
 0x1c1   :  { %v1234_v26 = vsub.f32 %v2518_v46, %v2569_v22 }
 0x1c2   :  { %v2152_v27 = vpop.f32.mrb[20].mxu0  ;;  %v1233_v28 = vsub.f32 %v2520_v49, %v2573_v25 }
 0x1c3   :  { %v2579_v29 = vmul.f32 8.0, %v2152_v27  ;;  %v912_v30 = vpop.f32.mrb[21].mxu0 }
 0x1c4   :  { %v2581_v31 = vmul.f32 8.0, %v912_v30 }
 0x1c5   :  { %v1236_v32 = vsub.f32 %v2522_v50, %v2579_v29 }
 0x1c6   :  { %v2155_v33 = vpop.f32.mrb[22].mxu0  ;;  %v2585_v34 = vpop.f32.mrb[2].mxu1  ;;  %v1235_v35 = vsub.f32 %v2524_v51, %v2581_v31 }
 0x1c7   :  { %v2589_v36 = vmul.f32 8.0, %v2155_v33  ;;  %v922_v37 = vpop.f32.mrb[23].mxu0  ;;  %v2591_v38 = vpop.f32.mrb[3].mxu1 }
 0x1c8   :  { %v2593_v39 = vmul.f32 8.0, %v922_v37 }
 0x1c9   :  { %v1238_v40 = vsub.f32 %v2533_v61, %v2589_v36 }
 0x1ca   :  { %v2158_v41 = vpop.f32.mrb[24].mxu0 }
 0x1cb   :  { %v2599_v43 = vmul.f32 8.0, %v2158_v41  ;;  %v932_v44 = vpop.f32.mrb[25].mxu0 }
 0x1cc   :  { %v2601_v45 = vmul.f32 8.0, %v932_v44 }
 0x1cd   :  { %v2798_v36 = vsub.f32 %v2543_v10, %v2599_v43 }
 0x1ce   :  { %v2161_v52 = vpop.f32.mrb[26].mxu0  ;;  %v2605_v54 = vpop.f32.mrb[4].mxu1 }
 0x1cf   :  { %v2609_v57 = vmul.f32 8.0, %v2161_v52  ;;  %v942_v58 = vpop.f32.mrb[27].mxu0  ;;  %v2611_v59 = vpop.f32.mrb[5].mxu1 }
 0x1d0   :  { %v2613_v60 = vmul.f32 8.0, %v942_v58 }
 0x1d2   :  { %v2164_v3 = vpop.f32.mrb[28].mxu0 }
 0x1d3   :  { %v2619_v6 = vmul.f32 8.0, %v2164_v3  ;;  %v952_v53 = vpop.f32.mrb[29].mxu0 }
 0x1d4   :  { %v2621_v7 = vmul.f32 8.0, %v952_v53 }
 0x1d6   :  { %v2167_v55 = vpop.f32.mrb[30].mxu0  ;;  %v2625_v9 = vpop.f32.mrb[6].mxu1 }
 0x1d7   :  { %v2629_v0 = vmul.f32 8.0, %v2167_v55  ;;  %v962_v14 = vpop.f32.mrb[31].mxu0  ;;  %v2631_v15 = vpop.f32.mrb[7].mxu1 }
 0x1d8   :  { %v2633_v16 = vmul.f32 8.0, %v962_v14 }
 0x1de   :  { %v2639_v22 = vpop.f32.mrb[8].mxu1 }
 0x1df   :  { %v2641_v23 = vpop.f32.mrb[9].mxu1 }
 0x1e6   :  { %v2643_v27 = vpop.f32.mrb[10].mxu1 }
 0x1e7   :  { %v2645_v30 = vpop.f32.mrb[11].mxu1 }
 0x1ee   :  { %v2647_v33 = vpop.f32.mrb[12].mxu1 }
 0x1ef   :  { %v2649_v37 = vpop.f32.mrb[13].mxu1 }
 0x1f6   :  { %v2651_v41 = vpop.f32.mrb[14].mxu1 }
 0x1f7   :  { %v2653_v44 = vpop.f32.mrb[15].mxu1 }
 0x1fa   :  { %v2172_v52 = vpop.f32.mrb[16].mxu1 }
 0x1fb   :  { %v1248_v58 = vmul.f32 %v2172_v52, %v1232_v18  ;;  %v1120_v3 = vpop.f32.mrb[17].mxu1 }
 0x1fc   :  { %v1247_v53 = vmul.f32 %v1231_v21, %v1120_v3 }
 0x1fd   :  { %v1264_v55 = vmul.f32 %v1248_v58, %v1248_v58 }
 0x1fe   :  { %v1263_v14 = vmul.f32 %v1247_v53, %v1247_v53  ;;  %v2175_v19 = vpop.f32.mrb[18].mxu1  ;;  %v2198_v17 = vpop.f32.mrb[32].mxu0 }
 0x1ff   :  { %v1250_v2 = vmul.f32 %v2175_v19, %v1234_v26  ;;  %v2655_v8 = vmul.f32 8.0, %v2198_v17  ;;  %v1130_v4 = vpop.f32.mrb[19].mxu1  ;;  %v1452_v62 = vpop.f32.mrb[33].mxu0 }
 0x200   :  { %v1279_v56 = vadd.f32 %v1264_v55, %v1263_v14  ;;  %v1249_v46 = vmul.f32 %v1233_v28, %v1130_v4  ;;  %v2660_v42 = vmul.f32 8.0, %v1452_v62 }
 0x201   :  { %v1792_v18 = vsub.f32 %v2565_v20, %v2655_v8  ;;  %v1266_v19 = vmul.f32 %v1250_v2, %v1250_v2  ;;  %v723_v20 = vpop.xlane.xlu1 %722 }
 0x202   :  { %v1265_v21 = vmul.f32 %v1249_v46, %v1249_v46  ;;  %v2178_v52 = vpop.f32.mrb[20].mxu1  ;;  %v1791_v58 = vsub.f32 %v2571_v24, %v2660_v42 }
 0x203   :  { %v1252_v26 = vmul.f32 %v2178_v52, %v1236_v32  ;;  %v1140_v17 = vpop.f32.mrb[21].mxu1 }
 0x204   :  { %v1280_v3 = vadd.f32 %v1279_v56, %v1265_v21  ;;  %v1251_v49 = vmul.f32 %v1235_v35, %v1140_v17  ;;  %v2797_v56 = vsub.f32 %v2535_v63, %v2593_v39  ;;  %v2799_v63 = vsub.f32 %v2545_v12, %v2601_v45 }
 0x205   :  { %v1268_v29 = vmul.f32 %v1252_v26, %v1252_v26 }
 0x206   :  { %v1267_v25 = vmul.f32 %v1251_v49, %v1251_v49  ;;  %v1281_v28 = vadd.f32 %v1280_v3, %v1266_v19  ;;  %v2181_v62 = vpop.f32.mrb[22].mxu1  ;;  %v2201_v4 = vpop.f32.mrb[34].mxu0 }
 0x207   :  { %v1254_v46 = vmul.f32 %v2181_v62, %v1238_v40  ;;  %v2675_v53 = vmul.f32 8.0, %v2201_v4  ;;  %v1150_v55 = vpop.f32.mrb[23].mxu1  ;;  %v1462_v50 = vpop.f32.mrb[35].mxu0 }
 0x208   :  { %v1282_v32 = vadd.f32 %v1281_v28, %v1267_v25  ;;  %v1253_v2 = vmul.f32 %v2797_v56, %v1150_v55  ;;  %v2680_v51 = vmul.f32 8.0, %v1462_v50  ;;  %v2800_v28 = vsub.f32 %v2547_v11, %v2609_v57 }
 0x209   :  { %v1794_v31 = vsub.f32 %v2585_v34, %v2675_v53  ;;  %v1270_v26 = vmul.f32 %v1254_v46, %v1254_v46  ;;  %v2801_v46 = vsub.f32 %v2549_v5, %v2613_v60  ;;  %v2802_v57 = vsub.f32 %v2551_v47, %v2619_v6  ;;  %v711_v53 = vpop.xlane.xlu0 %710 }
 0x20a   :  { %v1269_v35 = vmul.f32 %v1253_v2, %v1253_v2  ;;  %v1283_v14 = vadd.f32 %v1282_v32, %v1268_v29  ;;  %v2184_v21 = vpop.f32.mrb[24].mxu1  ;;  %v1793_v61 = vsub.f32 %v2591_v38, %v2680_v51  ;;  %v2803_v5 = vsub.f32 %v2553_v13, %v2621_v7 }
 0x20b   :  { %v1256_v40 = vmul.f32 %v2184_v21, %v2798_v36  ;;  %v1160_v52 = vpop.f32.mrb[25].mxu1 }
 0x20c   :  { %v1284_v17 = vadd.f32 %v1283_v14, %v1269_v35  ;;  %v1255_v39 = vmul.f32 %v2799_v63, %v1160_v52  ;;  %v2804_v63 = vsub.f32 %v2555_v48, %v2629_v0 }
 0x20d   :  { %v1272_v43 = vmul.f32 %v1256_v40, %v1256_v40 }
 0x20e   :  { %v1271_v19 = vmul.f32 %v1255_v39, %v1255_v39  ;;  %v1285_v3 = vadd.f32 %v1284_v17, %v1270_v26  ;;  %v2187_v49 = vpop.f32.mrb[26].mxu1  ;;  %v2204_v25 = vpop.f32.mrb[36].mxu0 }
 0x20f   :  { %v1258_v62 = vmul.f32 %v2187_v49, %v2800_v28  ;;  %v2695_v4 = vmul.f32 8.0, %v2204_v25  ;;  %v1170_v55 = vpop.f32.mrb[27].mxu1  ;;  %v1472_v10 = vpop.f32.mrb[37].mxu0  ;;  %v2805_v25 = vsub.f32 %v2557_v1, %v2633_v16 }
 0x210   :  { %v1286_v50 = vadd.f32 %v1285_v3, %v1271_v19  ;;  %v1257_v29 = vmul.f32 %v2801_v46, %v1170_v55  ;;  %v2700_v12 = vmul.f32 8.0, %v1472_v10 }
 0x211   :  { %v1796_v45 = vsub.f32 %v2605_v54, %v2695_v4  ;;  %v1274_v21 = vmul.f32 %v1258_v62, %v1258_v62 }
 0x212   :  { %v1273_v32 = vmul.f32 %v1257_v29, %v1257_v29  ;;  %v1287_v56 = vadd.f32 %v1286_v50, %v1272_v43  ;;  %v2190_v2 = vpop.f32.mrb[28].mxu1  ;;  %v1795_v11 = vsub.f32 %v2611_v59, %v2700_v12 }
 0x213   :  { %v1260_v35 = vmul.f32 %v2190_v2, %v2802_v57  ;;  %v1180_v14 = vpop.f32.mrb[29].mxu1 }
 0x214   :  { %v1288_v36 = vadd.f32 %v1287_v56, %v1273_v32  ;;  %v1259_v60 = vmul.f32 %v2803_v5, %v1180_v14 }
 0x215   :  { %v1276_v6 = vmul.f32 %v1260_v35, %v1260_v35 }
 0x216   :  { %v1275_v40 = vmul.f32 %v1259_v60, %v1259_v60  ;;  %v1289_v52 = vadd.f32 %v1288_v36, %v1274_v21  ;;  %v2193_v26 = vpop.f32.mrb[30].mxu1  ;;  %v2207_v17 = vpop.f32.mrb[38].mxu0  ;;  %v724_v60 = vrot.slane %v723_v20, 4 }
 0x217   :  { %v1262_v39 = vmul.f32 %v2193_v26, %v2804_v63  ;;  %v2715_v19 = vmul.f32 8.0, %v2207_v17  ;;  %v1190_v3 = vpop.f32.mrb[31].mxu1  ;;  %v1482_v47 = vpop.f32.mrb[39].mxu0 }
 0x218   :  { %v1290_v49 = vadd.f32 %v1289_v52, %v1275_v40  ;;  %v1261_v28 = vmul.f32 %v2805_v25, %v1190_v3  ;;  %v2720_v13 = vmul.f32 8.0, %v1482_v47  ;;  %v735_v17 = vpop.xlane.xlu1 %734  ;;  %v725_v34 = vadd.f32 %v724_v60, %v723_v20 }
 0x219   :  { %v1798_v7 = vsub.f32 %v2625_v9, %v2715_v19  ;;  %v1278_v0 = vmul.f32 %v1262_v39, %v1262_v39  ;;  %v736_v3 = vrot.slane %v735_v17, 4 }
 0x21a   :  { %v1277_v62 = vmul.f32 %v1261_v28, %v1261_v28  ;;  %v1291_v55 = vadd.f32 %v1290_v49, %v1276_v6  ;;  %v1797_v48 = vsub.f32 %v2631_v15, %v2720_v13  ;;  %v712_v49 = vrot.slane %v711_v53, 4 }
 0x21b   :  { %v737_v6 = vadd.f32 %v736_v3, %v735_v17 }
 0x21c   :  { %v1292_v10 = vadd.f32 %v1291_v55, %v1277_v62  ;;  %v713_v38 = vadd.f32 %v712_v49, %v711_v53 }
 0x21e   :  { %v2210_v43 = vpop.f32.mrb[40].mxu0  ;;  %v2224_v50 = vpop.f32.mrb[32].mxu1  ;;  %v1293_v46 = vadd.f32 %v1292_v10, %v1278_v0  ;;  %v726_v10 = vrot.slane %v725_v34, 2 }
 0x21f   :  { %v2726_v29 = vmul.f32 8.0, %v2210_v43  ;;  %v1808_v1 = vmul.f32 %v2224_v50, %v1792_v18  ;;  %v1492_v16 = vpop.f32.mrb[41].mxu0  ;;  %v1680_v32 = vpop.f32.mrb[33].mxu1 }
 0x220   :  { %v2731_v56 = vmul.f32 8.0, %v1492_v16  ;;  %v1807_v2 = vmul.f32 %v1791_v58, %v1680_v32  ;;  %1294 = vadd.xlane.f32.xlu1 %v1293_v46  ;;  %v738_v46 = vrot.slane %v737_v6, 2  ;;  %v727_v4 = vadd.f32 %v726_v10, %v725_v34 }
 0x221   :  { %v1824_v57 = vmul.f32 %v1808_v1, %v1808_v1  ;;  %v1800_v35 = vsub.f32 %v2639_v22, %v2726_v29  ;;  %v714_v1 = vrot.slane %v713_v38, 2 }
 0x222   :  { %v1823_v14 = vmul.f32 %v1807_v2, %v1807_v2  ;;  %v1799_v21 = vsub.f32 %v2641_v23, %v2731_v56 }
 0x224   :  { %v1839_v36 = vadd.f32 %v1824_v57, %v1823_v14  ;;  %v715_v57 = vadd.f32 %v714_v1, %v713_v38 }
 0x226   :  { %v2213_v8 = vpop.f32.mrb[42].mxu0  ;;  %v2227_v18 = vpop.f32.mrb[34].mxu1  ;;  %v716_v54 = vrot.slane %v715_v57, 1 }
 0x227   :  { %v2740_v5 = vmul.f32 8.0, %v2213_v8  ;;  %v1810_v24 = vmul.f32 %v2227_v18, %v1794_v31  ;;  %v1502_v42 = vpop.f32.mrb[43].mxu0  ;;  %v1690_v58 = vpop.f32.mrb[35].mxu1 }
 0x228   :  { %v2745_v40 = vmul.f32 8.0, %v1502_v42  ;;  %v1809_v52 = vmul.f32 %v1793_v61, %v1690_v58  ;;  %v728_v42 = vrot.slane %v727_v4, 1 }
 0x229   :  { %v1802_v26 = vsub.f32 %v2643_v27, %v2740_v5  ;;  %v1826_v31 = vmul.f32 %v1810_v24, %v1810_v24  ;;  %v717_v24 = vadd.f32 %v716_v54, %v715_v57 }
 0x22a   :  { %v1825_v63 = vmul.f32 %v1809_v52, %v1809_v52  ;;  %v1801_v39 = vsub.f32 %v2645_v30, %v2745_v40  ;;  %v729_v52 = vadd.f32 %v728_v42, %v727_v4 }
 0x22b   :  { %2246 = vpush %v717_v24 }
 0x22c   :  { %v1840_v47 = vadd.f32 %v1839_v36, %v1825_v63  ;;  %2248 = vpush %v729_v52 }
 0x22e   :  { %v2216_v25 = vpop.f32.mrb[44].mxu0  ;;  %v2230_v28 = vpop.f32.mrb[36].mxu1  ;;  %v1841_v62 = vadd.f32 %v1840_v47, %v1826_v31 }
 0x22f   :  { %v1788_v51 = vmul.f32 8.0, %v2216_v25  ;;  %v1812_v61 = vmul.f32 %v2230_v28, %v1796_v45  ;;  %v1512_v55 = vpop.f32.mrb[45].mxu0  ;;  %v1700_v0 = vpop.f32.mrb[37].mxu1  ;;  %v739_v45 = vadd.f32 %v738_v46, %v737_v6 }
 0x230   :  { %v1787_v43 = vmul.f32 8.0, %v1512_v55  ;;  %v1811_v50 = vmul.f32 %v1795_v11, %v1700_v0 }
 0x231   :  { %v1804_v16 = vsub.f32 %v2647_v33, %v1788_v51  ;;  %v1828_v14 = vmul.f32 %v1812_v61, %v1812_v61  ;;  %v740_v59 = vrot.slane %v739_v45, 1 }
 0x232   :  { %v1827_v32 = vmul.f32 %v1811_v50, %v1811_v50  ;;  %v1803_v2 = vsub.f32 %v2649_v37, %v1787_v43 }
 0x233   :  { %v741_v17 = vadd.f32 %v740_v59, %v739_v45 }
 0x234   :  { %v1842_v36 = vadd.f32 %v1841_v62, %v1827_v32 }
 0x235   :  { %2250 = vpush %v741_v17 }
 0x236   :  { %v2219_v20 = vpop.f32.mrb[46].mxu0  ;;  %v2233_v8 = vpop.f32.mrb[38].mxu1  ;;  %v1843_v18 = vadd.f32 %v1842_v36, %v1828_v14 }
 0x237   :  { %v1790_v12 = vmul.f32 8.0, %v2219_v20  ;;  %v1814_v33 = vmul.f32 %v2233_v8, %v1798_v7  ;;  %v1522_v11 = vpop.f32.mrb[47].mxu0  ;;  %v1710_v58 = vpop.f32.mrb[39].mxu1 }
 0x238   :  { %v1789_v37 = vmul.f32 8.0, %v1522_v11  ;;  %v1813_v60 = vmul.f32 %v1797_v48, %v1710_v58 }
 0x239   :  { %v1806_v63 = vsub.f32 %v2651_v41, %v1790_v12  ;;  %v1830_v53 = vmul.f32 %v1814_v33, %v1814_v33 }
 0x23a   :  { %v1805_v3 = vsub.f32 %v2653_v44, %v1789_v37  ;;  %v1829_v34 = vmul.f32 %v1813_v60, %v1813_v60 }
 0x23c   :  { %v1844_v9 = vadd.f32 %v1843_v18, %v1829_v34 }
 0x23e   :  { %v2236_v19 = vpop.f32.mrb[40].mxu1  ;;  %v1845_v7 = vadd.f32 %v1844_v9, %v1830_v53 }
 0x23f   :  { %v1816_v31 = vmul.f32 %v2236_v19, %v1800_v35  ;;  %v1720_v15 = vpop.f32.mrb[41].mxu1 }
 0x240   :  { %v1815_v13 = vmul.f32 %v1799_v21, %v1720_v15 }
 0x241   :  { %v1832_v41 = vmul.f32 %v1816_v31, %v1816_v31 }
 0x242   :  { %v1831_v48 = vmul.f32 %v1815_v13, %v1815_v13 }
 0x244   :  { %v1846_v47 = vadd.f32 %v1845_v7, %v1831_v48 }
 0x246   :  { %v2239_v44 = vpop.f32.mrb[42].mxu1  ;;  %v1847_v6 = vadd.f32 %v1846_v47, %v1832_v41 }
 0x247   :  { %v1818_v49 = vmul.f32 %v2239_v44, %v1802_v26  ;;  %v1730_v25 = vpop.f32.mrb[43].mxu1 }
 0x248   :  { %v1817_v22 = vmul.f32 %v1801_v39, %v1730_v25 }
 0x249   :  { %v1834_v35 = vmul.f32 %v1818_v49, %v1818_v49 }
 0x24a   :  { %v1833_v29 = vmul.f32 %v1817_v22, %v1817_v22 }
 0x24c   :  { %v1848_v28 = vadd.f32 %v1847_v6, %v1833_v29 }
 0x24e   :  { %v2242_v62 = vpop.f32.mrb[44].mxu1  ;;  %v1849_v23 = vadd.f32 %v1848_v28, %v1834_v35 }
 0x24f   :  { %v1820_v56 = vmul.f32 %v2242_v62, %v1804_v16  ;;  %v1740_v21 = vpop.f32.mrb[45].mxu1 }
 0x250   :  { %v1819_v38 = vmul.f32 %v1803_v2, %v1740_v21 }
 0x251   :  { %v1836_v61 = vmul.f32 %v1820_v56, %v1820_v56 }
 0x252   :  { %v1835_v51 = vmul.f32 %v1819_v38, %v1819_v38 }
 0x254   :  { %v1850_v55 = vadd.f32 %v1849_v23, %v1835_v51 }
 0x256   :  { %v2245_v0 = vpop.f32.mrb[46].mxu1  ;;  %v1851_v10 = vadd.f32 %v1850_v55, %v1836_v61 }
 0x257   :  { %v1822_v27 = vmul.f32 %v2245_v0, %v1806_v63  ;;  %v1750_v5 = vpop.f32.mrb[47].mxu1 }
 0x258   :  { %v1821_v26 = vmul.f32 %v1805_v3, %v1750_v5 }
 0x259   :  { %v1838_v50 = vmul.f32 %v1822_v27, %v1822_v27 }
 0x25a   :  { %v1837_v43 = vmul.f32 %v1821_v26, %v1821_v26 }
 0x25c   :  { %v1852_v30 = vadd.f32 %v1851_v10, %v1837_v43  ;;  %s2247_s1 = spop %2246 }
 0x25d   :  { %s2249_s4 = spop %2248  ;;  %s1863_s6 = smul.f32 2.0, %s2247_s1 }
 0x25e   :  { %v1853_v40 = vadd.f32 %v1852_v30, %v1838_v50  ;;  %s1866_s9 = smul.f32 2.0, %s2249_s4  ;;  %s1869_s10 = sadd.f32 %s2249_s4, %s2247_s1 }
 0x260   :  { %1854 = vadd.xlane.f32.xlu0 %v1853_v40 }
 0x266   :  { %s2251_s5 = spop %2250 }
 0x267   :  { %s1870_s14 = smul.f32 2.0, %s2251_s5 }
 0x269   :  { %s1871_s17 = ssub.f32 %s1869_s10, %s1870_s14 }
 0x2ad   :  { %v1295_v39 = vpop.xlane.xlu1 %1294 }
 0x2ae   :  { %v1296_v46 = vrot.slane %v1295_v39, 4 }
 0x2b0   :  { %v1297_v1 = vadd.f32 %v1296_v46, %v1295_v39 }
 0x2b2   :  { %v1298_v32 = vrot.slane %v1297_v1, 2 }
 0x2b4   :  { %v1299_v16 = vadd.f32 %v1298_v32, %v1297_v1 }
 0x2b6   :  { %v1300_v57 = vrot.slane %v1299_v16, 1 }
 0x2b8   :  { %v1301_v2 = vadd.f32 %v1300_v57, %v1299_v16 }
 0x2ba   :  { %2252 = vpush %v1301_v2 }
 0x2eb   :  { %s2253_s7 = spop %2252 }
 0x2ec   :  { %s1864_s8 = ssub.f32 %s2253_s7, %s1863_s6 }
 0x2ed   :  { %v1855_v14 = vpop.xlane.xlu0 %1854 }
 0x2ee   :  { %v1856_v36 = vrot.slane %v1855_v14, 4  ;;  %s1865_s13 = sadd.f32 32.0, %s1864_s8 }
 0x2f0   :  { %v1857_v54 = vadd.f32 %v1856_v36, %v1855_v14 }
 0x2f2   :  { %v1858_v4 = vrot.slane %v1857_v54, 2 }
 0x2f4   :  { %v1859_v45 = vadd.f32 %v1858_v4, %v1857_v54 }
 0x2f6   :  { %v1860_v20 = vrot.slane %v1859_v45, 1 }
 0x2f8   :  { %v1861_v8 = vadd.f32 %v1860_v20, %v1859_v45 }
 0x2fa   :  { %2254 = vpush %v1861_v8 }
 0x32b   :  { %s2255_s11 = spop %2254 }
 0x32c   :  { %s1867_s12 = ssub.f32 %s2255_s11, %s1866_s9 }
 0x32e   :  { %s1868_s15 = sadd.f32 32.0, %s1867_s12 }
 0x330   :  { %s1872_s16 = sadd.f32 %s1868_s15, %s1865_s13 }
 0x332   :  { %s1873_s18 = smul.f32 0.1, %s1872_s16 }
 0x334   :  { %s1874_s19 = sadd.f32 %s1873_s18, %s1871_s17 }
 0x336   :  { %1876 = sst [smem:[#allocation15]] %s1874_s19 }
 0x337   :  { %2317 = shalt.err (!%p2314_p4)
}
 0x338   :  { %s2327_s27 = smov [#allocation15]  }
 0x339   :  { %1884 = dma.smem_to_hbm %s2327_s27, 16, %s2796_s2, [#allocation12]  }
 0x33a   :  { %2322 = dma.done.wait [#allocation12], 16  }
 0x33b   :  { %2323 = vsyncadd [#allocation12], 4294967280 }
 0x33c   :  { %1888 = sfence }
 0x33d   :  { %1889 = vsyncpa [#allocation11], 1 }
 0x33e   :  { %1890 = vsyncpa [#allocation14], 1 }
 0x33f   :  { %1891 = vsyncpa [#allocation12], 1 }

</bundles_post_ra>
